<compile_context>
chip_gen: v6e
topology: v6e:2x2x1
jax: 0.10.0
libtpu: 0.0.40
codegen_flags: <defaults>
</compile_context>

<pallas_src>
import jax
import jax.numpy as jnp
import numpy as np
from jax.experimental import pallas as pl
from jax.experimental.pallas import tpu as pltpu


# --------------------------- fused bidirectional kernel -----------------------
def _bilstm_fused_kernel(xf_ref, xb_ref, wxf_ref, wxb_ref, bf_ref, bb_ref,
                         whf_ref, whb_ref, wef_ref, web_ref, be_ref,
                         outf_ref, outb_ref,
                         h_st, c_st, gxf_st, gxb_st, hf_blk, hb_blk):
    Tt, Bp, _ = xf_ref.shape
    H = h_st.shape[-1]
    nOut = outf_ref.shape[-1]
    cdt = wxf_ref.dtype                      # matmul operand dtype (bf16)

    @pl.when(pl.program_id(0) == 0)
    def _():
        h_st[...] = jnp.zeros_like(h_st)
        c_st[...] = jnp.zeros_like(c_st)

    # ---- hoisted input projection for this time block (one big MXU matmul
    #      per direction); gate pre-activations stay in VMEM ------------------
    xf2 = xf_ref[...].reshape(Tt * Bp, -1)
    xb2 = xb_ref[...].reshape(Tt * Bp, -1)
    gxf_st[...] = (jnp.dot(xf2, wxf_ref[...], preferred_element_type=jnp.float32)
                   + bf_ref[...]).reshape(Tt, Bp, 4 * H)
    gxb_st[...] = (jnp.dot(xb2, wxb_ref[...], preferred_element_type=jnp.float32)
                   + bb_ref[...]).reshape(Tt, Bp, 4 * H)

    whf = whf_ref[...]                       # (H, 4H), VMEM-resident
    whb = whb_ref[...]

    # Gate column order is [i, f, o, g]: one contiguous sigmoid slab, one tanh.
    def cell(gates, c_prev):
        ifo = jax.nn.sigmoid(gates[:, :3 * H])
        g = jnp.tanh(gates[:, 3 * H:])
        c_new = ifo[:, H:2 * H] * c_prev + ifo[:, :H] * g
        h_new = ifo[:, 2 * H:] * jnp.tanh(c_new)
        return h_new, c_new

    def step(j, carry):
        h_f, c_f, h_b, c_b = carry
        gf = gxf_st[j] + jnp.dot(h_f.astype(cdt), whf,
                                 preferred_element_type=jnp.float32)
        h_f, c_f = cell(gf, c_f)
        hf_blk[j] = h_f
        gb = gxb_st[Tt - 1 - j] + jnp.dot(h_b.astype(cdt), whb,
                                          preferred_element_type=jnp.float32)
        h_b, c_b = cell(gb, c_b)
        hb_blk[Tt - 1 - j] = h_b
        return h_f, c_f, h_b, c_b

    carry0 = (h_st[0], c_st[0], h_st[1], c_st[1])
    h_f, c_f, h_b, c_b = jax.lax.fori_loop(0, Tt, step, carry0, unroll=True)
    h_st[0] = h_f
    c_st[0] = c_f
    h_st[1] = h_b
    c_st[1] = c_b

    # ---- fused embedding epilogue: hidden states never leave VMEM -----------
    hf2 = hf_blk[...].reshape(Tt * Bp, H).astype(cdt)
    hb2 = hb_blk[...].reshape(Tt * Bp, H).astype(cdt)
    outf_ref[...] = (jnp.dot(hf2, wef_ref[...],
                             preferred_element_type=jnp.float32)
                     + be_ref[...]).reshape(Tt, Bp, nOut)
    outb_ref[...] = jnp.dot(hb2, web_ref[...],
                            preferred_element_type=jnp.float32
                            ).reshape(Tt, Bp, nOut)


# --------------------------- partial-output combine ---------------------------
def _add_kernel(a_ref, b_ref, o_ref):
    o_ref[...] = a_ref[...] + b_ref[...]


# --------------------------------- helpers ------------------------------------
def _pick_divisor(n, cap):
    for d in range(min(n, cap), 0, -1):
        if n % d == 0:
            return d
    return 1


def _pick_rows_block(n, cap=512):
    # largest multiple-of-8 divisor of n that is <= cap (n is a multiple of 8).
    best = min(n, 8)
    d = 8
    while d <= min(n, cap):
        if n % d == 0:
            best = d
        d += 8
    return best


def _const_spec(shape):
    # Grid-constant operand (weights / biases): single-buffered, fetched once.
    return pl.BlockSpec(shape, lambda g: (0,) * len(shape),
                        pipeline_mode=pl.Buffered(1))


def _reorder_ifog(w, axis):
    # PyTorch gate order [i, f, g, o] -> kernel order [i, f, o, g] along `axis`.
    i, f, g, o = jnp.split(w, 4, axis=axis)
    return jnp.concatenate([i, f, o, g], axis=axis)


def _prepare_weights(p, compute_dtype):
    H = p["nHidden"]
    wx_f = _reorder_ifog(p["w_ih_f"].T, 1).astype(compute_dtype)      # (nIn,4H)
    wx_b = _reorder_ifog(p["w_ih_b"].T, 1).astype(compute_dtype)
    b_f = _reorder_ifog((p["b_ih_f"] + p["b_hh_f"])[None, :], 1).astype(jnp.float32)
    b_b = _reorder_ifog((p["b_ih_b"] + p["b_hh_b"])[None, :], 1).astype(jnp.float32)
    whh_f = _reorder_ifog(p["w_hh_f"].T, 1).astype(compute_dtype)     # (H,4H)
    whh_b = _reorder_ifog(p["w_hh_b"].T, 1).astype(compute_dtype)
    wemb = p["w_emb"].T                                               # (2H,nOut)
    wemb_f = wemb[:H].astype(compute_dtype)
    wemb_b = wemb[H:].astype(compute_dtype)
    b_emb = p["b_emb"][None, :].astype(jnp.float32)
    return wx_f, wx_b, b_f, b_b, whh_f, whh_b, wemb_f, wemb_b, b_emb


# ------------------------------ module forward ---------------------------------
def bidirectional_lstm_forward(x, params, *, time_block=8, use_bf16=True,
                               vmem_limit_bytes=32 * 1024 * 1024):
    T, B, nIn = x.shape
    H = params["nHidden"]
    cdt = jnp.bfloat16 if use_bf16 else jnp.float32
    (wx_f, wx_b, b_f, b_b, whh_f, whh_b,
     wemb_f, wemb_b, b_emb) = _prepare_weights(params, cdt)
    nOut = wemb_f.shape[1]

    # Pad batch to a multiple of 8 so every block is sublane-aligned.
    Bp = ((B + 7) // 8) * 8
    xp = x if Bp == B else jnp.pad(x, ((0, 0), (0, Bp - B), (0, 0)))
    xp = xp.astype(cdt)

    # Time-block size: largest divisor of T <= time_block (see TODO above).
    Tt = _pick_divisor(T, time_block)
    nblk = T // Tt

    in_specs = [
        pl.BlockSpec((Tt, Bp, nIn), lambda g: (g, 0, 0)),              # x (fwd)
        pl.BlockSpec((Tt, Bp, nIn), lambda g: (nblk - 1 - g, 0, 0)),   # x (bwd)
        _const_spec((nIn, 4 * H)), _const_spec((nIn, 4 * H)),          # wx f/b
        _const_spec((1, 4 * H)), _const_spec((1, 4 * H)),              # bias f/b
        _const_spec((H, 4 * H)), _const_spec((H, 4 * H)),              # whh f/b
        _const_spec((H, nOut)), _const_spec((H, nOut)),                # wemb f/b
        _const_spec((1, nOut)),                                        # b_emb
    ]
    out_specs = (
        pl.BlockSpec((Tt, Bp, nOut), lambda g: (g, 0, 0)),             # fwd part
        pl.BlockSpec((Tt, Bp, nOut), lambda g: (nblk - 1 - g, 0, 0)),  # bwd part
    )
    scratch_shapes = [
        pltpu.VMEM((2, Bp, H), jnp.float32),          # h_f / h_b carry
        pltpu.VMEM((2, Bp, H), jnp.float32),          # c_f / c_b carry (fp32)
        pltpu.VMEM((Tt, Bp, 4 * H), jnp.float32),     # gx fwd (block-local)
        pltpu.VMEM((Tt, Bp, 4 * H), jnp.float32),     # gx bwd (block-local)
        pltpu.VMEM((Tt, Bp, H), jnp.float32),         # h fwd (block-local)
        pltpu.VMEM((Tt, Bp, H), jnp.float32),         # h bwd (block-local)
    ]

    w_isz = jnp.dtype(cdt).itemsize
    flops = int(2 * T * Bp * nIn * 8 * H           # input projection, both dirs
                + 2 * T * Bp * H * 8 * H           # recurrent matmuls
                + 4 * T * Bp * H * nOut            # embedding epilogue
                + 14 * T * Bp * H)                 # gate / state elementwise
    bytes_accessed = int(
        2 * T * Bp * nIn * w_isz
        + (2 * nIn * 4 * H + 2 * H * 4 * H + 2 * H * nOut) * w_isz
        + (8 * H + nOut) * 4
        + 2 * T * Bp * nOut * 4)

    out_f, out_b = pl.pallas_call(
        _bilstm_fused_kernel,
        out_shape=(jax.ShapeDtypeStruct((T, Bp, nOut), jnp.float32),
                   jax.ShapeDtypeStruct((T, Bp, nOut), jnp.float32)),
        grid_spec=pltpu.PrefetchScalarGridSpec(
            num_scalar_prefetch=0,
            grid=(nblk,),
            in_specs=in_specs,
            out_specs=out_specs,
            scratch_shapes=scratch_shapes),
        # The h/c carry in scratch requires sequential execution of the
        # time-block axis -> must stay "arbitrary", never "parallel".
        compiler_params=pltpu.CompilerParams(
            dimension_semantics=("arbitrary",),
            vmem_limit_bytes=vmem_limit_bytes),
        cost_estimate=pl.CostEstimate(
            flops=flops,
            transcendentals=int(10 * T * Bp * H),
            bytes_accessed=bytes_accessed),
    )(xp, xp, wx_f, wx_b, b_f, b_b, whh_f, whh_b, wemb_f, wemb_b, b_emb)

    # ---- combine the two per-direction partial outputs ----------------------
    rows = T * Bp
    rb = _pick_rows_block(rows, 512)
    out2d = pl.pallas_call(
        _add_kernel,
        out_shape=jax.ShapeDtypeStruct((rows, nOut), jnp.float32),
        grid=(rows // rb,),
        in_specs=[pl.BlockSpec((rb, nOut), lambda r: (r, 0)),
                  pl.BlockSpec((rb, nOut), lambda r: (r, 0))],
        out_specs=pl.BlockSpec((rb, nOut), lambda r: (r, 0)),
        compiler_params=pltpu.CompilerParams(
            dimension_semantics=("parallel",)),
    )(out_f.reshape(rows, nOut), out_b.reshape(rows, nOut))

    out = out2d.reshape(T, Bp, nOut)
    return out[:, :B, :] if Bp != B else out


# ------------------------------- JAX reference ---------------------------------
def _ref_lstm_dir(x, w_ih, w_hh, b_ih, b_hh, H, reverse):
    def step(carry, xt):
        h, c = carry
        gates = xt @ w_ih.T + b_ih + h @ w_hh.T + b_hh
        i, f, g, o = jnp.split(gates, 4, axis=-1)
        i, f, o = jax.nn.sigmoid(i), jax.nn.sigmoid(f), jax.nn.sigmoid(o)
        g = jnp.tanh(g)
        c = f * c + i * g
        h = o * jnp.tanh(c)
        return (h, c), h

    B = x.shape[1]
    init = (jnp.zeros((B, H), jnp.float32), jnp.zeros((B, H), jnp.float32))
    xs = x[::-1] if reverse else x
    _, hs = jax.lax.scan(step, init, xs)
    return hs[::-1] if reverse else hs


def _ref_forward(x, p):
    H = p["nHidden"]
    hf = _ref_lstm_dir(x, p["w_ih_f"], p["w_hh_f"], p["b_ih_f"], p["b_hh_f"], H, False)
    hb = _ref_lstm_dir(x, p["w_ih_b"], p["w_hh_b"], p["b_ih_b"], p["b_hh_b"], H, True)
    rec = jnp.concatenate([hf, hb], axis=-1)
    T, B, _ = rec.shape
    out = rec.reshape(T * B, -1) @ p["w_emb"].T + p["b_emb"]
    return out.reshape(T, B, -1)


# ------------------------------------ main --------------------------------------
if __name__ == "__main__":
    # Small shapes consistent with the module's forward: input (T, b, nIn).
    T, B, nIn, nHidden, nOut = 16, 2, 32, 32, 16

    key = jax.random.PRNGKey(0)
    ks = jax.random.split(key, 12)
    s = 1.0 / np.sqrt(nHidden)   # PyTorch-style uniform(-1/sqrt(H), 1/sqrt(H))

    def u(k, shape):
        return jax.random.uniform(k, shape, jnp.float32, -s, s)

    params = {
        "nHidden": nHidden,
        # forward direction
        "w_ih_f": u(ks[0], (4 * nHidden, nIn)),
        "w_hh_f": u(ks[1], (4 * nHidden, nHidden)),
        "b_ih_f": u(ks[2], (4 * nHidden,)),
        "b_hh_f": u(ks[3], (4 * nHidden,)),
        # backward direction
        "w_ih_b": u(ks[4], (4 * nHidden, nIn)),
        "w_hh_b": u(ks[5], (4 * nHidden, nHidden)),
        "b_ih_b": u(ks[6], (4 * nHidden,)),
        "b_hh_b": u(ks[7], (4 * nHidden,)),
        # embedding Linear(2H -> nOut)
        "w_emb": u(ks[8], (nOut, 2 * nHidden)),
        "b_emb": u(ks[9], (nOut,)),
    }

    x = jax.random.normal(ks[10], (T, B, nIn), jnp.float32)

    # time_block=8 -> 2 grid steps, exercising the cross-block h/c carry.
    out = jax.block_until_ready(
        bidirectional_lstm_forward(x, params, time_block=8, use_bf16=True))
    ref = jax.block_until_ready(_ref_forward(x, params))

    assert out.shape == (T, B, nOut), out.shape
    # bf16 matmul operands (fp32 accumulation / fp32 cell state) vs fp32 ref.
    np.testing.assert_allclose(np.asarray(out, dtype=np.float32),
                               np.asarray(ref), rtol=2e-2, atol=2e-2)
    print("KERNEL_OK")
</pallas_src>

<mosaic_0001>
module attributes {stable_mosaic.version = 11 : i64} {
  func.func @_bilstm_fused_kernel(%arg0: i32, %arg1: memref<8x8x32xbf16, #tpu.memory_space<vmem>>, %arg2: memref<8x8x32xbf16, #tpu.memory_space<vmem>>, %arg3: memref<32x128xbf16, #tpu.memory_space<vmem>>, %arg4: memref<32x128xbf16, #tpu.memory_space<vmem>>, %arg5: memref<1x128xf32, #tpu.memory_space<vmem>>, %arg6: memref<1x128xf32, #tpu.memory_space<vmem>>, %arg7: memref<32x128xbf16, #tpu.memory_space<vmem>>, %arg8: memref<32x128xbf16, #tpu.memory_space<vmem>>, %arg9: memref<32x16xbf16, #tpu.memory_space<vmem>>, %arg10: memref<32x16xbf16, #tpu.memory_space<vmem>>, %arg11: memref<1x16xf32, #tpu.memory_space<vmem>>, %arg12: memref<8x8x16xf32, #tpu.memory_space<vmem>>, %arg13: memref<8x8x16xf32, #tpu.memory_space<vmem>>, %arg14: memref<2x8x32xf32, #tpu.memory_space<vmem>>, %arg15: memref<2x8x32xf32, #tpu.memory_space<vmem>>, %arg16: memref<8x8x128xf32, #tpu.memory_space<vmem>>, %arg17: memref<8x8x128xf32, #tpu.memory_space<vmem>>, %arg18: memref<8x8x32xf32, #tpu.memory_space<vmem>>, %arg19: memref<8x8x32xf32, #tpu.memory_space<vmem>>) attributes {dimension_semantics = [#tpu.dimension_semantics<arbitrary>], iteration_bounds = array<i64: 2>, scalar_prefetch = 0 : i64, scratch_operands = 6 : i64, tpu.core_type = #tpu.core_type<tc>, window_params = [{transform_indices = @transform_0, window_bounds = array<i64: 8, 8, 32>}, {transform_indices = @transform_1, window_bounds = array<i64: 8, 8, 32>}, {pipeline_mode = #tpu.pipeline_mode<synchronous>, transform_indices = @transform_2, window_bounds = array<i64: 32, 128>}, {pipeline_mode = #tpu.pipeline_mode<synchronous>, transform_indices = @transform_3, window_bounds = array<i64: 32, 128>}, {pipeline_mode = #tpu.pipeline_mode<synchronous>, transform_indices = @transform_4, window_bounds = array<i64: 1, 128>}, {pipeline_mode = #tpu.pipeline_mode<synchronous>, transform_indices = @transform_5, window_bounds = array<i64: 1, 128>}, {pipeline_mode = #tpu.pipeline_mode<synchronous>, transform_indices = @transform_6, window_bounds = array<i64: 32, 128>}, {pipeline_mode = #tpu.pipeline_mode<synchronous>, transform_indices = @transform_7, window_bounds = array<i64: 32, 128>}, {pipeline_mode = #tpu.pipeline_mode<synchronous>, transform_indices = @transform_8, window_bounds = array<i64: 32, 16>}, {pipeline_mode = #tpu.pipeline_mode<synchronous>, transform_indices = @transform_9, window_bounds = array<i64: 32, 16>}, {pipeline_mode = #tpu.pipeline_mode<synchronous>, transform_indices = @transform_10, window_bounds = array<i64: 1, 16>}, {transform_indices = @transform_11, window_bounds = array<i64: 8, 8, 16>}, {transform_indices = @transform_12, window_bounds = array<i64: 8, 8, 16>}]} {
    %c0_i32 = arith.constant 0 : i32
    %0 = arith.cmpi eq, %arg0, %c0_i32 : i32
    %1 = arith.extui %0 : i1 to i32
    %c0_i32_0 = arith.constant 0 : i32
    %2 = arith.cmpi ne, %1, %c0_i32_0 : i32
    scf.if %2 {
      %cst_181 = arith.constant 0.000000e+00 : f32
      %492 = vector.broadcast %cst_181 : f32 to vector<2x8x32xf32>
      %c0_182 = arith.constant 0 : index
      %c0_183 = arith.constant 0 : index
      %c0_184 = arith.constant 0 : index
      %493 = vector.load %arg14[%c0_182, %c0_183, %c0_184] : memref<2x8x32xf32, #tpu.memory_space<vmem>>, vector<2x8x32xf32>
      tpu.vector_store %arg14[%c0_182, %c0_183, %c0_184], %492 {strides = array<i32>} : memref<2x8x32xf32, #tpu.memory_space<vmem>>, vector<2x8x32xf32>,
      %cst_185 = arith.constant 0.000000e+00 : f32
      %494 = vector.broadcast %cst_185 : f32 to vector<2x8x32xf32>
      %c0_186 = arith.constant 0 : index
      %c0_187 = arith.constant 0 : index
      %c0_188 = arith.constant 0 : index
      %495 = vector.load %arg15[%c0_186, %c0_187, %c0_188] : memref<2x8x32xf32, #tpu.memory_space<vmem>>, vector<2x8x32xf32>
      tpu.vector_store %arg15[%c0_186, %c0_187, %c0_188], %494 {strides = array<i32>} : memref<2x8x32xf32, #tpu.memory_space<vmem>>, vector<2x8x32xf32>,
    } else {
    }
    %c0 = arith.constant 0 : index
    %c0_1 = arith.constant 0 : index
    %c0_2 = arith.constant 0 : index
    %3 = vector.load %arg1[%c0, %c0_1, %c0_2] : memref<8x8x32xbf16, #tpu.memory_space<vmem>>, vector<8x8x32xbf16>
    %4 = vector.shape_cast %3 : vector<8x8x32xbf16> to vector<64x32xbf16>
    %c0_3 = arith.constant 0 : index
    %c0_4 = arith.constant 0 : index
    %c0_5 = arith.constant 0 : index
    %5 = vector.load %arg2[%c0_3, %c0_4, %c0_5] : memref<8x8x32xbf16, #tpu.memory_space<vmem>>, vector<8x8x32xbf16>
    %6 = vector.shape_cast %5 : vector<8x8x32xbf16> to vector<64x32xbf16>
    %c0_6 = arith.constant 0 : index
    %c0_7 = arith.constant 0 : index
    %7 = vector.load %arg3[%c0_6, %c0_7] : memref<32x128xbf16, #tpu.memory_space<vmem>>, vector<32x128xbf16>
    %cst = arith.constant dense<0.000000e+00> : vector<64x128xf32>
    %8 = tpu.matmul %4, %7, %cst {dimension_numbers = #tpu.dot_dimension_numbers<[1], [0], [0], [1], [0, 0, 1, 1], [], []>} : vector<64x32xbf16>, vector<32x128xbf16>, vector<64x128xf32> -> vector<64x128xf32>
    %c0_8 = arith.constant 0 : index
    %c0_9 = arith.constant 0 : index
    %9 = vector.load %arg5[%c0_8, %c0_9] : memref<1x128xf32, #tpu.memory_space<vmem>>, vector<1x128xf32>
    %10 = vector.broadcast %9 : vector<1x128xf32> to vector<64x128xf32>
    %11 = arith.addf %8, %10 : vector<64x128xf32>
    %12 = vector.shape_cast %11 : vector<64x128xf32> to vector<8x8x128xf32>
    %c0_10 = arith.constant 0 : index
    %c0_11 = arith.constant 0 : index
    %c0_12 = arith.constant 0 : index
    %13 = vector.load %arg16[%c0_10, %c0_11, %c0_12] : memref<8x8x128xf32, #tpu.memory_space<vmem>>, vector<8x8x128xf32>
    tpu.vector_store %arg16[%c0_10, %c0_11, %c0_12], %12 {strides = array<i32>} : memref<8x8x128xf32, #tpu.memory_space<vmem>>, vector<8x8x128xf32>,
    %c0_13 = arith.constant 0 : index
    %c0_14 = arith.constant 0 : index
    %14 = vector.load %arg4[%c0_13, %c0_14] : memref<32x128xbf16, #tpu.memory_space<vmem>>, vector<32x128xbf16>
    %cst_15 = arith.constant dense<0.000000e+00> : vector<64x128xf32>
    %15 = tpu.matmul %6, %14, %cst_15 {dimension_numbers = #tpu.dot_dimension_numbers<[1], [0], [0], [1], [0, 0, 1, 1], [], []>} : vector<64x32xbf16>, vector<32x128xbf16>, vector<64x128xf32> -> vector<64x128xf32>
    %c0_16 = arith.constant 0 : index
    %c0_17 = arith.constant 0 : index
    %16 = vector.load %arg6[%c0_16, %c0_17] : memref<1x128xf32, #tpu.memory_space<vmem>>, vector<1x128xf32>
    %17 = vector.broadcast %16 : vector<1x128xf32> to vector<64x128xf32>
    %18 = arith.addf %15, %17 : vector<64x128xf32>
    %19 = vector.shape_cast %18 : vector<64x128xf32> to vector<8x8x128xf32>
    %c0_18 = arith.constant 0 : index
    %c0_19 = arith.constant 0 : index
    %c0_20 = arith.constant 0 : index
    %20 = vector.load %arg17[%c0_18, %c0_19, %c0_20] : memref<8x8x128xf32, #tpu.memory_space<vmem>>, vector<8x8x128xf32>
    tpu.vector_store %arg17[%c0_18, %c0_19, %c0_20], %19 {strides = array<i32>} : memref<8x8x128xf32, #tpu.memory_space<vmem>>, vector<8x8x128xf32>,
    %c0_21 = arith.constant 0 : index
    %c0_22 = arith.constant 0 : index
    %21 = vector.load %arg7[%c0_21, %c0_22] : memref<32x128xbf16, #tpu.memory_space<vmem>>, vector<32x128xbf16>
    %c0_23 = arith.constant 0 : index
    %c0_24 = arith.constant 0 : index
    %22 = vector.load %arg8[%c0_23, %c0_24] : memref<32x128xbf16, #tpu.memory_space<vmem>>, vector<32x128xbf16>
    %c0_25 = arith.constant 0 : index
    %c0_26 = arith.constant 0 : index
    %c0_27 = arith.constant 0 : index
    %23 = vector.load %arg14[%c0_25, %c0_26, %c0_27] : memref<2x8x32xf32, #tpu.memory_space<vmem>>, vector<1x8x32xf32>
    %24 = vector.shape_cast %23 : vector<1x8x32xf32> to vector<8x32xf32>
    %c0_28 = arith.constant 0 : index
    %c0_29 = arith.constant 0 : index
    %c0_30 = arith.constant 0 : index
    %25 = vector.load %arg15[%c0_28, %c0_29, %c0_30] : memref<2x8x32xf32, #tpu.memory_space<vmem>>, vector<1x8x32xf32>
    %26 = vector.shape_cast %25 : vector<1x8x32xf32> to vector<8x32xf32>
    %c1 = arith.constant 1 : index
    %c0_31 = arith.constant 0 : index
    %c0_32 = arith.constant 0 : index
    %27 = vector.load %arg14[%c1, %c0_31, %c0_32] : memref<2x8x32xf32, #tpu.memory_space<vmem>>, vector<1x8x32xf32>
    %28 = vector.shape_cast %27 : vector<1x8x32xf32> to vector<8x32xf32>
    %c1_33 = arith.constant 1 : index
    %c0_34 = arith.constant 0 : index
    %c0_35 = arith.constant 0 : index
    %29 = vector.load %arg15[%c1_33, %c0_34, %c0_35] : memref<2x8x32xf32, #tpu.memory_space<vmem>>, vector<1x8x32xf32>
    %30 = vector.shape_cast %29 : vector<1x8x32xf32> to vector<8x32xf32>
    %c0_i32_36 = arith.constant 0 : i32
    %31 = arith.index_cast %c0_i32_36 : i32 to index
    %c0_37 = arith.constant 0 : index
    %c0_38 = arith.constant 0 : index
    %32 = vector.load %arg16[%31, %c0_37, %c0_38] : memref<8x8x128xf32, #tpu.memory_space<vmem>>, vector<1x8x128xf32>
    %33 = vector.shape_cast %32 : vector<1x8x128xf32> to vector<8x128xf32>
    %34 = arith.truncf %24 : vector<8x32xf32> to vector<8x32xbf16>
    %cst_39 = arith.constant dense<0.000000e+00> : vector<8x128xf32>
    %35 = tpu.matmul %34, %21, %cst_39 {dimension_numbers = #tpu.dot_dimension_numbers<[1], [0], [0], [1], [0, 0, 1, 1], [], []>} : vector<8x32xbf16>, vector<32x128xbf16>, vector<8x128xf32> -> vector<8x128xf32>
    %36 = arith.addf %33, %35 : vector<8x128xf32>
    %37 = vector.extract_strided_slice %36 {offsets = [0, 0], sizes = [8, 96], strides = [1, 1]} : vector<8x128xf32> to vector<8x96xf32>
    %38 = arith.negf %37 : vector<8x96xf32>
    %39 = math.exp %38 : vector<8x96xf32>
    %cst_40 = arith.constant 1.000000e+00 : f32
    %40 = vector.broadcast %cst_40 : f32 to vector<8x96xf32>
    %41 = arith.addf %40, %39 : vector<8x96xf32>
    %42 = arith.divf %40, %41 : vector<8x96xf32>
    %43 = vector.extract_strided_slice %36 {offsets = [0, 96], sizes = [8, 32], strides = [1, 1]} : vector<8x128xf32> to vector<8x32xf32>
    %44 = math.tanh %43 : vector<8x32xf32>
    %45 = vector.extract_strided_slice %42 {offsets = [0, 32], sizes = [8, 32], strides = [1, 1]} : vector<8x96xf32> to vector<8x32xf32>
    %46 = arith.mulf %45, %26 : vector<8x32xf32>
    %47 = vector.extract_strided_slice %42 {offsets = [0, 0], sizes = [8, 32], strides = [1, 1]} : vector<8x96xf32> to vector<8x32xf32>
    %48 = arith.mulf %47, %44 : vector<8x32xf32>
    %49 = arith.addf %46, %48 : vector<8x32xf32>
    %50 = vector.extract_strided_slice %42 {offsets = [0, 64], sizes = [8, 32], strides = [1, 1]} : vector<8x96xf32> to vector<8x32xf32>
    %51 = math.tanh %49 : vector<8x32xf32>
    %52 = arith.mulf %50, %51 : vector<8x32xf32>
    %53 = arith.index_cast %c0_i32_36 : i32 to index
    %c0_41 = arith.constant 0 : index
    %c0_42 = arith.constant 0 : index
    %54 = vector.load %arg18[%53, %c0_41, %c0_42] : memref<8x8x32xf32, #tpu.memory_space<vmem>>, vector<1x8x32xf32>
    %55 = vector.shape_cast %54 : vector<1x8x32xf32> to vector<8x32xf32>
    %56 = vector.shape_cast %52 : vector<8x32xf32> to vector<1x8x32xf32>
    tpu.vector_store %arg18[%53, %c0_41, %c0_42], %56 {strides = array<i32>} : memref<8x8x32xf32, #tpu.memory_space<vmem>>, vector<1x8x32xf32>,
    %c7_i32 = arith.constant 7 : i32
    %57 = arith.subi %c7_i32, %c0_i32_36 : i32
    %58 = arith.index_cast %57 : i32 to index
    %c0_43 = arith.constant 0 : index
    %c0_44 = arith.constant 0 : index
    %59 = vector.load %arg17[%58, %c0_43, %c0_44] : memref<8x8x128xf32, #tpu.memory_space<vmem>>, vector<1x8x128xf32>
    %60 = vector.shape_cast %59 : vector<1x8x128xf32> to vector<8x128xf32>
    %61 = arith.truncf %28 : vector<8x32xf32> to vector<8x32xbf16>
    %cst_45 = arith.constant dense<0.000000e+00> : vector<8x128xf32>
    %62 = tpu.matmul %61, %22, %cst_45 {dimension_numbers = #tpu.dot_dimension_numbers<[1], [0], [0], [1], [0, 0, 1, 1], [], []>} : vector<8x32xbf16>, vector<32x128xbf16>, vector<8x128xf32> -> vector<8x128xf32>
    %63 = arith.addf %60, %62 : vector<8x128xf32>
    %64 = vector.extract_strided_slice %63 {offsets = [0, 0], sizes = [8, 96], strides = [1, 1]} : vector<8x128xf32> to vector<8x96xf32>
    %65 = arith.negf %64 : vector<8x96xf32>
    %66 = math.exp %65 : vector<8x96xf32>
    %cst_46 = arith.constant 1.000000e+00 : f32
    %67 = vector.broadcast %cst_46 : f32 to vector<8x96xf32>
    %68 = arith.addf %67, %66 : vector<8x96xf32>
    %69 = arith.divf %67, %68 : vector<8x96xf32>
    %70 = vector.extract_strided_slice %63 {offsets = [0, 96], sizes = [8, 32], strides = [1, 1]} : vector<8x128xf32> to vector<8x32xf32>
    %71 = math.tanh %70 : vector<8x32xf32>
    %72 = vector.extract_strided_slice %69 {offsets = [0, 32], sizes = [8, 32], strides = [1, 1]} : vector<8x96xf32> to vector<8x32xf32>
    %73 = arith.mulf %72, %30 : vector<8x32xf32>
    %74 = vector.extract_strided_slice %69 {offsets = [0, 0], sizes = [8, 32], strides = [1, 1]} : vector<8x96xf32> to vector<8x32xf32>
    %75 = arith.mulf %74, %71 : vector<8x32xf32>
    %76 = arith.addf %73, %75 : vector<8x32xf32>
    %77 = vector.extract_strided_slice %69 {offsets = [0, 64], sizes = [8, 32], strides = [1, 1]} : vector<8x96xf32> to vector<8x32xf32>
    %78 = math.tanh %76 : vector<8x32xf32>
    %79 = arith.mulf %77, %78 : vector<8x32xf32>
    %c7_i32_47 = arith.constant 7 : i32
    %80 = arith.subi %c7_i32_47, %c0_i32_36 : i32
    %81 = arith.index_cast %80 : i32 to index
    %c0_48 = arith.constant 0 : index
    %c0_49 = arith.constant 0 : index
    %82 = vector.load %arg19[%81, %c0_48, %c0_49] : memref<8x8x32xf32, #tpu.memory_space<vmem>>, vector<1x8x32xf32>
    %83 = vector.shape_cast %82 : vector<1x8x32xf32> to vector<8x32xf32>
    %84 = vector.shape_cast %79 : vector<8x32xf32> to vector<1x8x32xf32>
    tpu.vector_store %arg19[%81, %c0_48, %c0_49], %84 {strides = array<i32>} : memref<8x8x32xf32, #tpu.memory_space<vmem>>, vector<1x8x32xf32>,
    %c1_i32 = arith.constant 1 : i32
    %85 = arith.index_cast %c1_i32 : i32 to index
    %c0_50 = arith.constant 0 : index
    %c0_51 = arith.constant 0 : index
    %86 = vector.load %arg16[%85, %c0_50, %c0_51] : memref<8x8x128xf32, #tpu.memory_space<vmem>>, vector<1x8x128xf32>
    %87 = vector.shape_cast %86 : vector<1x8x128xf32> to vector<8x128xf32>
    %88 = arith.truncf %52 : vector<8x32xf32> to vector<8x32xbf16>
    %cst_52 = arith.constant dense<0.000000e+00> : vector<8x128xf32>
    %89 = tpu.matmul %88, %21, %cst_52 {dimension_numbers = #tpu.dot_dimension_numbers<[1], [0], [0], [1], [0, 0, 1, 1], [], []>} : vector<8x32xbf16>, vector<32x128xbf16>, vector<8x128xf32> -> vector<8x128xf32>
    %90 = arith.addf %87, %89 : vector<8x128xf32>
    %91 = vector.extract_strided_slice %90 {offsets = [0, 0], sizes = [8, 96], strides = [1, 1]} : vector<8x128xf32> to vector<8x96xf32>
    %92 = arith.negf %91 : vector<8x96xf32>
    %93 = math.exp %92 : vector<8x96xf32>
    %cst_53 = arith.constant 1.000000e+00 : f32
    %94 = vector.broadcast %cst_53 : f32 to vector<8x96xf32>
    %95 = arith.addf %94, %93 : vector<8x96xf32>
    %96 = arith.divf %94, %95 : vector<8x96xf32>
    %97 = vector.extract_strided_slice %90 {offsets = [0, 96], sizes = [8, 32], strides = [1, 1]} : vector<8x128xf32> to vector<8x32xf32>
    %98 = math.tanh %97 : vector<8x32xf32>
    %99 = vector.extract_strided_slice %96 {offsets = [0, 32], sizes = [8, 32], strides = [1, 1]} : vector<8x96xf32> to vector<8x32xf32>
    %100 = arith.mulf %99, %49 : vector<8x32xf32>
    %101 = vector.extract_strided_slice %96 {offsets = [0, 0], sizes = [8, 32], strides = [1, 1]} : vector<8x96xf32> to vector<8x32xf32>
    %102 = arith.mulf %101, %98 : vector<8x32xf32>
    %103 = arith.addf %100, %102 : vector<8x32xf32>
    %104 = vector.extract_strided_slice %96 {offsets = [0, 64], sizes = [8, 32], strides = [1, 1]} : vector<8x96xf32> to vector<8x32xf32>
    %105 = math.tanh %103 : vector<8x32xf32>
    %106 = arith.mulf %104, %105 : vector<8x32xf32>
    %107 = arith.index_cast %c1_i32 : i32 to index
    %c0_54 = arith.constant 0 : index
    %c0_55 = arith.constant 0 : index
    %108 = vector.load %arg18[%107, %c0_54, %c0_55] : memref<8x8x32xf32, #tpu.memory_space<vmem>>, vector<1x8x32xf32>
    %109 = vector.shape_cast %108 : vector<1x8x32xf32> to vector<8x32xf32>
    %110 = vector.shape_cast %106 : vector<8x32xf32> to vector<1x8x32xf32>
    tpu.vector_store %arg18[%107, %c0_54, %c0_55], %110 {strides = array<i32>} : memref<8x8x32xf32, #tpu.memory_space<vmem>>, vector<1x8x32xf32>,
    %c7_i32_56 = arith.constant 7 : i32
    %111 = arith.subi %c7_i32_56, %c1_i32 : i32
    %112 = arith.index_cast %111 : i32 to index
    %c0_57 = arith.constant 0 : index
    %c0_58 = arith.constant 0 : index
    %113 = vector.load %arg17[%112, %c0_57, %c0_58] : memref<8x8x128xf32, #tpu.memory_space<vmem>>, vector<1x8x128xf32>
    %114 = vector.shape_cast %113 : vector<1x8x128xf32> to vector<8x128xf32>
    %115 = arith.truncf %79 : vector<8x32xf32> to vector<8x32xbf16>
    %cst_59 = arith.constant dense<0.000000e+00> : vector<8x128xf32>
    %116 = tpu.matmul %115, %22, %cst_59 {dimension_numbers = #tpu.dot_dimension_numbers<[1], [0], [0], [1], [0, 0, 1, 1], [], []>} : vector<8x32xbf16>, vector<32x128xbf16>, vector<8x128xf32> -> vector<8x128xf32>
    %117 = arith.addf %114, %116 : vector<8x128xf32>
    %118 = vector.extract_strided_slice %117 {offsets = [0, 0], sizes = [8, 96], strides = [1, 1]} : vector<8x128xf32> to vector<8x96xf32>
    %119 = arith.negf %118 : vector<8x96xf32>
    %120 = math.exp %119 : vector<8x96xf32>
    %cst_60 = arith.constant 1.000000e+00 : f32
    %121 = vector.broadcast %cst_60 : f32 to vector<8x96xf32>
    %122 = arith.addf %121, %120 : vector<8x96xf32>
    %123 = arith.divf %121, %122 : vector<8x96xf32>
    %124 = vector.extract_strided_slice %117 {offsets = [0, 96], sizes = [8, 32], strides = [1, 1]} : vector<8x128xf32> to vector<8x32xf32>
    %125 = math.tanh %124 : vector<8x32xf32>
    %126 = vector.extract_strided_slice %123 {offsets = [0, 32], sizes = [8, 32], strides = [1, 1]} : vector<8x96xf32> to vector<8x32xf32>
    %127 = arith.mulf %126, %76 : vector<8x32xf32>
    %128 = vector.extract_strided_slice %123 {offsets = [0, 0], sizes = [8, 32], strides = [1, 1]} : vector<8x96xf32> to vector<8x32xf32>
    %129 = arith.mulf %128, %125 : vector<8x32xf32>
    %130 = arith.addf %127, %129 : vector<8x32xf32>
    %131 = vector.extract_strided_slice %123 {offsets = [0, 64], sizes = [8, 32], strides = [1, 1]} : vector<8x96xf32> to vector<8x32xf32>
    %132 = math.tanh %130 : vector<8x32xf32>
    %133 = arith.mulf %131, %132 : vector<8x32xf32>
    %c7_i32_61 = arith.constant 7 : i32
    %134 = arith.subi %c7_i32_61, %c1_i32 : i32
    %135 = arith.index_cast %134 : i32 to index
    %c0_62 = arith.constant 0 : index
    %c0_63 = arith.constant 0 : index
    %136 = vector.load %arg19[%135, %c0_62, %c0_63] : memref<8x8x32xf32, #tpu.memory_space<vmem>>, vector<1x8x32xf32>
    %137 = vector.shape_cast %136 : vector<1x8x32xf32> to vector<8x32xf32>
    %138 = vector.shape_cast %133 : vector<8x32xf32> to vector<1x8x32xf32>
    tpu.vector_store %arg19[%135, %c0_62, %c0_63], %138 {strides = array<i32>} : memref<8x8x32xf32, #tpu.memory_space<vmem>>, vector<1x8x32xf32>,
    %c2_i32 = arith.constant 2 : i32
    %139 = arith.index_cast %c2_i32 : i32 to index
    %c0_64 = arith.constant 0 : index
    %c0_65 = arith.constant 0 : index
    %140 = vector.load %arg16[%139, %c0_64, %c0_65] : memref<8x8x128xf32, #tpu.memory_space<vmem>>, vector<1x8x128xf32>
    %141 = vector.shape_cast %140 : vector<1x8x128xf32> to vector<8x128xf32>
    %142 = arith.truncf %106 : vector<8x32xf32> to vector<8x32xbf16>
    %cst_66 = arith.constant dense<0.000000e+00> : vector<8x128xf32>
    %143 = tpu.matmul %142, %21, %cst_66 {dimension_numbers = #tpu.dot_dimension_numbers<[1], [0], [0], [1], [0, 0, 1, 1], [], []>} : vector<8x32xbf16>, vector<32x128xbf16>, vector<8x128xf32> -> vector<8x128xf32>
    %144 = arith.addf %141, %143 : vector<8x128xf32>
    %145 = vector.extract_strided_slice %144 {offsets = [0, 0], sizes = [8, 96], strides = [1, 1]} : vector<8x128xf32> to vector<8x96xf32>
    %146 = arith.negf %145 : vector<8x96xf32>
    %147 = math.exp %146 : vector<8x96xf32>
    %cst_67 = arith.constant 1.000000e+00 : f32
    %148 = vector.broadcast %cst_67 : f32 to vector<8x96xf32>
    %149 = arith.addf %148, %147 : vector<8x96xf32>
    %150 = arith.divf %148, %149 : vector<8x96xf32>
    %151 = vector.extract_strided_slice %144 {offsets = [0, 96], sizes = [8, 32], strides = [1, 1]} : vector<8x128xf32> to vector<8x32xf32>
    %152 = math.tanh %151 : vector<8x32xf32>
    %153 = vector.extract_strided_slice %150 {offsets = [0, 32], sizes = [8, 32], strides = [1, 1]} : vector<8x96xf32> to vector<8x32xf32>
    %154 = arith.mulf %153, %103 : vector<8x32xf32>
    %155 = vector.extract_strided_slice %150 {offsets = [0, 0], sizes = [8, 32], strides = [1, 1]} : vector<8x96xf32> to vector<8x32xf32>
    %156 = arith.mulf %155, %152 : vector<8x32xf32>
    %157 = arith.addf %154, %156 : vector<8x32xf32>
    %158 = vector.extract_strided_slice %150 {offsets = [0, 64], sizes = [8, 32], strides = [1, 1]} : vector<8x96xf32> to vector<8x32xf32>
    %159 = math.tanh %157 : vector<8x32xf32>
    %160 = arith.mulf %158, %159 : vector<8x32xf32>
    %161 = arith.index_cast %c2_i32 : i32 to index
    %c0_68 = arith.constant 0 : index
    %c0_69 = arith.constant 0 : index
    %162 = vector.load %arg18[%161, %c0_68, %c0_69] : memref<8x8x32xf32, #tpu.memory_space<vmem>>, vector<1x8x32xf32>
    %163 = vector.shape_cast %162 : vector<1x8x32xf32> to vector<8x32xf32>
    %164 = vector.shape_cast %160 : vector<8x32xf32> to vector<1x8x32xf32>
    tpu.vector_store %arg18[%161, %c0_68, %c0_69], %164 {strides = array<i32>} : memref<8x8x32xf32, #tpu.memory_space<vmem>>, vector<1x8x32xf32>,
    %c7_i32_70 = arith.constant 7 : i32
    %165 = arith.subi %c7_i32_70, %c2_i32 : i32
    %166 = arith.index_cast %165 : i32 to index
    %c0_71 = arith.constant 0 : index
    %c0_72 = arith.constant 0 : index
    %167 = vector.load %arg17[%166, %c0_71, %c0_72] : memref<8x8x128xf32, #tpu.memory_space<vmem>>, vector<1x8x128xf32>
    %168 = vector.shape_cast %167 : vector<1x8x128xf32> to vector<8x128xf32>
    %169 = arith.truncf %133 : vector<8x32xf32> to vector<8x32xbf16>
    %cst_73 = arith.constant dense<0.000000e+00> : vector<8x128xf32>
    %170 = tpu.matmul %169, %22, %cst_73 {dimension_numbers = #tpu.dot_dimension_numbers<[1], [0], [0], [1], [0, 0, 1, 1], [], []>} : vector<8x32xbf16>, vector<32x128xbf16>, vector<8x128xf32> -> vector<8x128xf32>
    %171 = arith.addf %168, %170 : vector<8x128xf32>
    %172 = vector.extract_strided_slice %171 {offsets = [0, 0], sizes = [8, 96], strides = [1, 1]} : vector<8x128xf32> to vector<8x96xf32>
    %173 = arith.negf %172 : vector<8x96xf32>
    %174 = math.exp %173 : vector<8x96xf32>
    %cst_74 = arith.constant 1.000000e+00 : f32
    %175 = vector.broadcast %cst_74 : f32 to vector<8x96xf32>
    %176 = arith.addf %175, %174 : vector<8x96xf32>
    %177 = arith.divf %175, %176 : vector<8x96xf32>
    %178 = vector.extract_strided_slice %171 {offsets = [0, 96], sizes = [8, 32], strides = [1, 1]} : vector<8x128xf32> to vector<8x32xf32>
    %179 = math.tanh %178 : vector<8x32xf32>
    %180 = vector.extract_strided_slice %177 {offsets = [0, 32], sizes = [8, 32], strides = [1, 1]} : vector<8x96xf32> to vector<8x32xf32>
    %181 = arith.mulf %180, %130 : vector<8x32xf32>
    %182 = vector.extract_strided_slice %177 {offsets = [0, 0], sizes = [8, 32], strides = [1, 1]} : vector<8x96xf32> to vector<8x32xf32>
    %183 = arith.mulf %182, %179 : vector<8x32xf32>
    %184 = arith.addf %181, %183 : vector<8x32xf32>
    %185 = vector.extract_strided_slice %177 {offsets = [0, 64], sizes = [8, 32], strides = [1, 1]} : vector<8x96xf32> to vector<8x32xf32>
    %186 = math.tanh %184 : vector<8x32xf32>
    %187 = arith.mulf %185, %186 : vector<8x32xf32>
    %c7_i32_75 = arith.constant 7 : i32
    %188 = arith.subi %c7_i32_75, %c2_i32 : i32
    %189 = arith.index_cast %188 : i32 to index
    %c0_76 = arith.constant 0 : index
    %c0_77 = arith.constant 0 : index
    %190 = vector.load %arg19[%189, %c0_76, %c0_77] : memref<8x8x32xf32, #tpu.memory_space<vmem>>, vector<1x8x32xf32>
    %191 = vector.shape_cast %190 : vector<1x8x32xf32> to vector<8x32xf32>
    %192 = vector.shape_cast %187 : vector<8x32xf32> to vector<1x8x32xf32>
    tpu.vector_store %arg19[%189, %c0_76, %c0_77], %192 {strides = array<i32>} : memref<8x8x32xf32, #tpu.memory_space<vmem>>, vector<1x8x32xf32>,
    %c3_i32 = arith.constant 3 : i32
    %193 = arith.index_cast %c3_i32 : i32 to index
    %c0_78 = arith.constant 0 : index
    %c0_79 = arith.constant 0 : index
    %194 = vector.load %arg16[%193, %c0_78, %c0_79] : memref<8x8x128xf32, #tpu.memory_space<vmem>>, vector<1x8x128xf32>
    %195 = vector.shape_cast %194 : vector<1x8x128xf32> to vector<8x128xf32>
    %196 = arith.truncf %160 : vector<8x32xf32> to vector<8x32xbf16>
    %cst_80 = arith.constant dense<0.000000e+00> : vector<8x128xf32>
    %197 = tpu.matmul %196, %21, %cst_80 {dimension_numbers = #tpu.dot_dimension_numbers<[1], [0], [0], [1], [0, 0, 1, 1], [], []>} : vector<8x32xbf16>, vector<32x128xbf16>, vector<8x128xf32> -> vector<8x128xf32>
    %198 = arith.addf %195, %197 : vector<8x128xf32>
    %199 = vector.extract_strided_slice %198 {offsets = [0, 0], sizes = [8, 96], strides = [1, 1]} : vector<8x128xf32> to vector<8x96xf32>
    %200 = arith.negf %199 : vector<8x96xf32>
    %201 = math.exp %200 : vector<8x96xf32>
    %cst_81 = arith.constant 1.000000e+00 : f32
    %202 = vector.broadcast %cst_81 : f32 to vector<8x96xf32>
    %203 = arith.addf %202, %201 : vector<8x96xf32>
    %204 = arith.divf %202, %203 : vector<8x96xf32>
    %205 = vector.extract_strided_slice %198 {offsets = [0, 96], sizes = [8, 32], strides = [1, 1]} : vector<8x128xf32> to vector<8x32xf32>
    %206 = math.tanh %205 : vector<8x32xf32>
    %207 = vector.extract_strided_slice %204 {offsets = [0, 32], sizes = [8, 32], strides = [1, 1]} : vector<8x96xf32> to vector<8x32xf32>
    %208 = arith.mulf %207, %157 : vector<8x32xf32>
    %209 = vector.extract_strided_slice %204 {offsets = [0, 0], sizes = [8, 32], strides = [1, 1]} : vector<8x96xf32> to vector<8x32xf32>
    %210 = arith.mulf %209, %206 : vector<8x32xf32>
    %211 = arith.addf %208, %210 : vector<8x32xf32>
    %212 = vector.extract_strided_slice %204 {offsets = [0, 64], sizes = [8, 32], strides = [1, 1]} : vector<8x96xf32> to vector<8x32xf32>
    %213 = math.tanh %211 : vector<8x32xf32>
    %214 = arith.mulf %212, %213 : vector<8x32xf32>
    %215 = arith.index_cast %c3_i32 : i32 to index
    %c0_82 = arith.constant 0 : index
    %c0_83 = arith.constant 0 : index
    %216 = vector.load %arg18[%215, %c0_82, %c0_83] : memref<8x8x32xf32, #tpu.memory_space<vmem>>, vector<1x8x32xf32>
    %217 = vector.shape_cast %216 : vector<1x8x32xf32> to vector<8x32xf32>
    %218 = vector.shape_cast %214 : vector<8x32xf32> to vector<1x8x32xf32>
    tpu.vector_store %arg18[%215, %c0_82, %c0_83], %218 {strides = array<i32>} : memref<8x8x32xf32, #tpu.memory_space<vmem>>, vector<1x8x32xf32>,
    %c7_i32_84 = arith.constant 7 : i32
    %219 = arith.subi %c7_i32_84, %c3_i32 : i32
    %220 = arith.index_cast %219 : i32 to index
    %c0_85 = arith.constant 0 : index
    %c0_86 = arith.constant 0 : index
    %221 = vector.load %arg17[%220, %c0_85, %c0_86] : memref<8x8x128xf32, #tpu.memory_space<vmem>>, vector<1x8x128xf32>
    %222 = vector.shape_cast %221 : vector<1x8x128xf32> to vector<8x128xf32>
    %223 = arith.truncf %187 : vector<8x32xf32> to vector<8x32xbf16>
    %cst_87 = arith.constant dense<0.000000e+00> : vector<8x128xf32>
    %224 = tpu.matmul %223, %22, %cst_87 {dimension_numbers = #tpu.dot_dimension_numbers<[1], [0], [0], [1], [0, 0, 1, 1], [], []>} : vector<8x32xbf16>, vector<32x128xbf16>, vector<8x128xf32> -> vector<8x128xf32>
    %225 = arith.addf %222, %224 : vector<8x128xf32>
    %226 = vector.extract_strided_slice %225 {offsets = [0, 0], sizes = [8, 96], strides = [1, 1]} : vector<8x128xf32> to vector<8x96xf32>
    %227 = arith.negf %226 : vector<8x96xf32>
    %228 = math.exp %227 : vector<8x96xf32>
    %cst_88 = arith.constant 1.000000e+00 : f32
    %229 = vector.broadcast %cst_88 : f32 to vector<8x96xf32>
    %230 = arith.addf %229, %228 : vector<8x96xf32>
    %231 = arith.divf %229, %230 : vector<8x96xf32>
    %232 = vector.extract_strided_slice %225 {offsets = [0, 96], sizes = [8, 32], strides = [1, 1]} : vector<8x128xf32> to vector<8x32xf32>
    %233 = math.tanh %232 : vector<8x32xf32>
    %234 = vector.extract_strided_slice %231 {offsets = [0, 32], sizes = [8, 32], strides = [1, 1]} : vector<8x96xf32> to vector<8x32xf32>
    %235 = arith.mulf %234, %184 : vector<8x32xf32>
    %236 = vector.extract_strided_slice %231 {offsets = [0, 0], sizes = [8, 32], strides = [1, 1]} : vector<8x96xf32> to vector<8x32xf32>
    %237 = arith.mulf %236, %233 : vector<8x32xf32>
    %238 = arith.addf %235, %237 : vector<8x32xf32>
    %239 = vector.extract_strided_slice %231 {offsets = [0, 64], sizes = [8, 32], strides = [1, 1]} : vector<8x96xf32> to vector<8x32xf32>
    %240 = math.tanh %238 : vector<8x32xf32>
    %241 = arith.mulf %239, %240 : vector<8x32xf32>
    %c7_i32_89 = arith.constant 7 : i32
    %242 = arith.subi %c7_i32_89, %c3_i32 : i32
    %243 = arith.index_cast %242 : i32 to index
    %c0_90 = arith.constant 0 : index
    %c0_91 = arith.constant 0 : index
    %244 = vector.load %arg19[%243, %c0_90, %c0_91] : memref<8x8x32xf32, #tpu.memory_space<vmem>>, vector<1x8x32xf32>
    %245 = vector.shape_cast %244 : vector<1x8x32xf32> to vector<8x32xf32>
    %246 = vector.shape_cast %241 : vector<8x32xf32> to vector<1x8x32xf32>
    tpu.vector_store %arg19[%243, %c0_90, %c0_91], %246 {strides = array<i32>} : memref<8x8x32xf32, #tpu.memory_space<vmem>>, vector<1x8x32xf32>,
    %c4_i32 = arith.constant 4 : i32
    %247 = arith.index_cast %c4_i32 : i32 to index
    %c0_92 = arith.constant 0 : index
    %c0_93 = arith.constant 0 : index
    %248 = vector.load %arg16[%247, %c0_92, %c0_93] : memref<8x8x128xf32, #tpu.memory_space<vmem>>, vector<1x8x128xf32>
    %249 = vector.shape_cast %248 : vector<1x8x128xf32> to vector<8x128xf32>
    %250 = arith.truncf %214 : vector<8x32xf32> to vector<8x32xbf16>
    %cst_94 = arith.constant dense<0.000000e+00> : vector<8x128xf32>
    %251 = tpu.matmul %250, %21, %cst_94 {dimension_numbers = #tpu.dot_dimension_numbers<[1], [0], [0], [1], [0, 0, 1, 1], [], []>} : vector<8x32xbf16>, vector<32x128xbf16>, vector<8x128xf32> -> vector<8x128xf32>
    %252 = arith.addf %249, %251 : vector<8x128xf32>
    %253 = vector.extract_strided_slice %252 {offsets = [0, 0], sizes = [8, 96], strides = [1, 1]} : vector<8x128xf32> to vector<8x96xf32>
    %254 = arith.negf %253 : vector<8x96xf32>
    %255 = math.exp %254 : vector<8x96xf32>
    %cst_95 = arith.constant 1.000000e+00 : f32
    %256 = vector.broadcast %cst_95 : f32 to vector<8x96xf32>
    %257 = arith.addf %256, %255 : vector<8x96xf32>
    %258 = arith.divf %256, %257 : vector<8x96xf32>
    %259 = vector.extract_strided_slice %252 {offsets = [0, 96], sizes = [8, 32], strides = [1, 1]} : vector<8x128xf32> to vector<8x32xf32>
    %260 = math.tanh %259 : vector<8x32xf32>
    %261 = vector.extract_strided_slice %258 {offsets = [0, 32], sizes = [8, 32], strides = [1, 1]} : vector<8x96xf32> to vector<8x32xf32>
    %262 = arith.mulf %261, %211 : vector<8x32xf32>
    %263 = vector.extract_strided_slice %258 {offsets = [0, 0], sizes = [8, 32], strides = [1, 1]} : vector<8x96xf32> to vector<8x32xf32>
    %264 = arith.mulf %263, %260 : vector<8x32xf32>
    %265 = arith.addf %262, %264 : vector<8x32xf32>
    %266 = vector.extract_strided_slice %258 {offsets = [0, 64], sizes = [8, 32], strides = [1, 1]} : vector<8x96xf32> to vector<8x32xf32>
    %267 = math.tanh %265 : vector<8x32xf32>
    %268 = arith.mulf %266, %267 : vector<8x32xf32>
    %269 = arith.index_cast %c4_i32 : i32 to index
    %c0_96 = arith.constant 0 : index
    %c0_97 = arith.constant 0 : index
    %270 = vector.load %arg18[%269, %c0_96, %c0_97] : memref<8x8x32xf32, #tpu.memory_space<vmem>>, vector<1x8x32xf32>
    %271 = vector.shape_cast %270 : vector<1x8x32xf32> to vector<8x32xf32>
    %272 = vector.shape_cast %268 : vector<8x32xf32> to vector<1x8x32xf32>
    tpu.vector_store %arg18[%269, %c0_96, %c0_97], %272 {strides = array<i32>} : memref<8x8x32xf32, #tpu.memory_space<vmem>>, vector<1x8x32xf32>,
    %c7_i32_98 = arith.constant 7 : i32
    %273 = arith.subi %c7_i32_98, %c4_i32 : i32
    %274 = arith.index_cast %273 : i32 to index
    %c0_99 = arith.constant 0 : index
    %c0_100 = arith.constant 0 : index
    %275 = vector.load %arg17[%274, %c0_99, %c0_100] : memref<8x8x128xf32, #tpu.memory_space<vmem>>, vector<1x8x128xf32>
    %276 = vector.shape_cast %275 : vector<1x8x128xf32> to vector<8x128xf32>
    %277 = arith.truncf %241 : vector<8x32xf32> to vector<8x32xbf16>
    %cst_101 = arith.constant dense<0.000000e+00> : vector<8x128xf32>
    %278 = tpu.matmul %277, %22, %cst_101 {dimension_numbers = #tpu.dot_dimension_numbers<[1], [0], [0], [1], [0, 0, 1, 1], [], []>} : vector<8x32xbf16>, vector<32x128xbf16>, vector<8x128xf32> -> vector<8x128xf32>
    %279 = arith.addf %276, %278 : vector<8x128xf32>
    %280 = vector.extract_strided_slice %279 {offsets = [0, 0], sizes = [8, 96], strides = [1, 1]} : vector<8x128xf32> to vector<8x96xf32>
    %281 = arith.negf %280 : vector<8x96xf32>
    %282 = math.exp %281 : vector<8x96xf32>
    %cst_102 = arith.constant 1.000000e+00 : f32
    %283 = vector.broadcast %cst_102 : f32 to vector<8x96xf32>
    %284 = arith.addf %283, %282 : vector<8x96xf32>
    %285 = arith.divf %283, %284 : vector<8x96xf32>
    %286 = vector.extract_strided_slice %279 {offsets = [0, 96], sizes = [8, 32], strides = [1, 1]} : vector<8x128xf32> to vector<8x32xf32>
    %287 = math.tanh %286 : vector<8x32xf32>
    %288 = vector.extract_strided_slice %285 {offsets = [0, 32], sizes = [8, 32], strides = [1, 1]} : vector<8x96xf32> to vector<8x32xf32>
    %289 = arith.mulf %288, %238 : vector<8x32xf32>
    %290 = vector.extract_strided_slice %285 {offsets = [0, 0], sizes = [8, 32], strides = [1, 1]} : vector<8x96xf32> to vector<8x32xf32>
    %291 = arith.mulf %290, %287 : vector<8x32xf32>
    %292 = arith.addf %289, %291 : vector<8x32xf32>
    %293 = vector.extract_strided_slice %285 {offsets = [0, 64], sizes = [8, 32], strides = [1, 1]} : vector<8x96xf32> to vector<8x32xf32>
    %294 = math.tanh %292 : vector<8x32xf32>
    %295 = arith.mulf %293, %294 : vector<8x32xf32>
    %c7_i32_103 = arith.constant 7 : i32
    %296 = arith.subi %c7_i32_103, %c4_i32 : i32
    %297 = arith.index_cast %296 : i32 to index
    %c0_104 = arith.constant 0 : index
    %c0_105 = arith.constant 0 : index
    %298 = vector.load %arg19[%297, %c0_104, %c0_105] : memref<8x8x32xf32, #tpu.memory_space<vmem>>, vector<1x8x32xf32>
    %299 = vector.shape_cast %298 : vector<1x8x32xf32> to vector<8x32xf32>
    %300 = vector.shape_cast %295 : vector<8x32xf32> to vector<1x8x32xf32>
    tpu.vector_store %arg19[%297, %c0_104, %c0_105], %300 {strides = array<i32>} : memref<8x8x32xf32, #tpu.memory_space<vmem>>, vector<1x8x32xf32>,
    %c5_i32 = arith.constant 5 : i32
    %301 = arith.index_cast %c5_i32 : i32 to index
    %c0_106 = arith.constant 0 : index
    %c0_107 = arith.constant 0 : index
    %302 = vector.load %arg16[%301, %c0_106, %c0_107] : memref<8x8x128xf32, #tpu.memory_space<vmem>>, vector<1x8x128xf32>
    %303 = vector.shape_cast %302 : vector<1x8x128xf32> to vector<8x128xf32>
    %304 = arith.truncf %268 : vector<8x32xf32> to vector<8x32xbf16>
    %cst_108 = arith.constant dense<0.000000e+00> : vector<8x128xf32>
    %305 = tpu.matmul %304, %21, %cst_108 {dimension_numbers = #tpu.dot_dimension_numbers<[1], [0], [0], [1], [0, 0, 1, 1], [], []>} : vector<8x32xbf16>, vector<32x128xbf16>, vector<8x128xf32> -> vector<8x128xf32>
    %306 = arith.addf %303, %305 : vector<8x128xf32>
    %307 = vector.extract_strided_slice %306 {offsets = [0, 0], sizes = [8, 96], strides = [1, 1]} : vector<8x128xf32> to vector<8x96xf32>
    %308 = arith.negf %307 : vector<8x96xf32>
    %309 = math.exp %308 : vector<8x96xf32>
    %cst_109 = arith.constant 1.000000e+00 : f32
    %310 = vector.broadcast %cst_109 : f32 to vector<8x96xf32>
    %311 = arith.addf %310, %309 : vector<8x96xf32>
    %312 = arith.divf %310, %311 : vector<8x96xf32>
    %313 = vector.extract_strided_slice %306 {offsets = [0, 96], sizes = [8, 32], strides = [1, 1]} : vector<8x128xf32> to vector<8x32xf32>
    %314 = math.tanh %313 : vector<8x32xf32>
    %315 = vector.extract_strided_slice %312 {offsets = [0, 32], sizes = [8, 32], strides = [1, 1]} : vector<8x96xf32> to vector<8x32xf32>
    %316 = arith.mulf %315, %265 : vector<8x32xf32>
    %317 = vector.extract_strided_slice %312 {offsets = [0, 0], sizes = [8, 32], strides = [1, 1]} : vector<8x96xf32> to vector<8x32xf32>
    %318 = arith.mulf %317, %314 : vector<8x32xf32>
    %319 = arith.addf %316, %318 : vector<8x32xf32>
    %320 = vector.extract_strided_slice %312 {offsets = [0, 64], sizes = [8, 32], strides = [1, 1]} : vector<8x96xf32> to vector<8x32xf32>
    %321 = math.tanh %319 : vector<8x32xf32>
    %322 = arith.mulf %320, %321 : vector<8x32xf32>
    %323 = arith.index_cast %c5_i32 : i32 to index
    %c0_110 = arith.constant 0 : index
    %c0_111 = arith.constant 0 : index
    %324 = vector.load %arg18[%323, %c0_110, %c0_111] : memref<8x8x32xf32, #tpu.memory_space<vmem>>, vector<1x8x32xf32>
    %325 = vector.shape_cast %324 : vector<1x8x32xf32> to vector<8x32xf32>
    %326 = vector.shape_cast %322 : vector<8x32xf32> to vector<1x8x32xf32>
    tpu.vector_store %arg18[%323, %c0_110, %c0_111], %326 {strides = array<i32>} : memref<8x8x32xf32, #tpu.memory_space<vmem>>, vector<1x8x32xf32>,
    %c7_i32_112 = arith.constant 7 : i32
    %327 = arith.subi %c7_i32_112, %c5_i32 : i32
    %328 = arith.index_cast %327 : i32 to index
    %c0_113 = arith.constant 0 : index
    %c0_114 = arith.constant 0 : index
    %329 = vector.load %arg17[%328, %c0_113, %c0_114] : memref<8x8x128xf32, #tpu.memory_space<vmem>>, vector<1x8x128xf32>
    %330 = vector.shape_cast %329 : vector<1x8x128xf32> to vector<8x128xf32>
    %331 = arith.truncf %295 : vector<8x32xf32> to vector<8x32xbf16>
    %cst_115 = arith.constant dense<0.000000e+00> : vector<8x128xf32>
    %332 = tpu.matmul %331, %22, %cst_115 {dimension_numbers = #tpu.dot_dimension_numbers<[1], [0], [0], [1], [0, 0, 1, 1], [], []>} : vector<8x32xbf16>, vector<32x128xbf16>, vector<8x128xf32> -> vector<8x128xf32>
    %333 = arith.addf %330, %332 : vector<8x128xf32>
    %334 = vector.extract_strided_slice %333 {offsets = [0, 0], sizes = [8, 96], strides = [1, 1]} : vector<8x128xf32> to vector<8x96xf32>
    %335 = arith.negf %334 : vector<8x96xf32>
    %336 = math.exp %335 : vector<8x96xf32>
    %cst_116 = arith.constant 1.000000e+00 : f32
    %337 = vector.broadcast %cst_116 : f32 to vector<8x96xf32>
    %338 = arith.addf %337, %336 : vector<8x96xf32>
    %339 = arith.divf %337, %338 : vector<8x96xf32>
    %340 = vector.extract_strided_slice %333 {offsets = [0, 96], sizes = [8, 32], strides = [1, 1]} : vector<8x128xf32> to vector<8x32xf32>
    %341 = math.tanh %340 : vector<8x32xf32>
    %342 = vector.extract_strided_slice %339 {offsets = [0, 32], sizes = [8, 32], strides = [1, 1]} : vector<8x96xf32> to vector<8x32xf32>
    %343 = arith.mulf %342, %292 : vector<8x32xf32>
    %344 = vector.extract_strided_slice %339 {offsets = [0, 0], sizes = [8, 32], strides = [1, 1]} : vector<8x96xf32> to vector<8x32xf32>
    %345 = arith.mulf %344, %341 : vector<8x32xf32>
    %346 = arith.addf %343, %345 : vector<8x32xf32>
    %347 = vector.extract_strided_slice %339 {offsets = [0, 64], sizes = [8, 32], strides = [1, 1]} : vector<8x96xf32> to vector<8x32xf32>
    %348 = math.tanh %346 : vector<8x32xf32>
    %349 = arith.mulf %347, %348 : vector<8x32xf32>
    %c7_i32_117 = arith.constant 7 : i32
    %350 = arith.subi %c7_i32_117, %c5_i32 : i32
    %351 = arith.index_cast %350 : i32 to index
    %c0_118 = arith.constant 0 : index
    %c0_119 = arith.constant 0 : index
    %352 = vector.load %arg19[%351, %c0_118, %c0_119] : memref<8x8x32xf32, #tpu.memory_space<vmem>>, vector<1x8x32xf32>
    %353 = vector.shape_cast %352 : vector<1x8x32xf32> to vector<8x32xf32>
    %354 = vector.shape_cast %349 : vector<8x32xf32> to vector<1x8x32xf32>
    tpu.vector_store %arg19[%351, %c0_118, %c0_119], %354 {strides = array<i32>} : memref<8x8x32xf32, #tpu.memory_space<vmem>>, vector<1x8x32xf32>,
    %c6_i32 = arith.constant 6 : i32
    %355 = arith.index_cast %c6_i32 : i32 to index
    %c0_120 = arith.constant 0 : index
    %c0_121 = arith.constant 0 : index
    %356 = vector.load %arg16[%355, %c0_120, %c0_121] : memref<8x8x128xf32, #tpu.memory_space<vmem>>, vector<1x8x128xf32>
    %357 = vector.shape_cast %356 : vector<1x8x128xf32> to vector<8x128xf32>
    %358 = arith.truncf %322 : vector<8x32xf32> to vector<8x32xbf16>
    %cst_122 = arith.constant dense<0.000000e+00> : vector<8x128xf32>
    %359 = tpu.matmul %358, %21, %cst_122 {dimension_numbers = #tpu.dot_dimension_numbers<[1], [0], [0], [1], [0, 0, 1, 1], [], []>} : vector<8x32xbf16>, vector<32x128xbf16>, vector<8x128xf32> -> vector<8x128xf32>
    %360 = arith.addf %357, %359 : vector<8x128xf32>
    %361 = vector.extract_strided_slice %360 {offsets = [0, 0], sizes = [8, 96], strides = [1, 1]} : vector<8x128xf32> to vector<8x96xf32>
    %362 = arith.negf %361 : vector<8x96xf32>
    %363 = math.exp %362 : vector<8x96xf32>
    %cst_123 = arith.constant 1.000000e+00 : f32
    %364 = vector.broadcast %cst_123 : f32 to vector<8x96xf32>
    %365 = arith.addf %364, %363 : vector<8x96xf32>
    %366 = arith.divf %364, %365 : vector<8x96xf32>
    %367 = vector.extract_strided_slice %360 {offsets = [0, 96], sizes = [8, 32], strides = [1, 1]} : vector<8x128xf32> to vector<8x32xf32>
    %368 = math.tanh %367 : vector<8x32xf32>
    %369 = vector.extract_strided_slice %366 {offsets = [0, 32], sizes = [8, 32], strides = [1, 1]} : vector<8x96xf32> to vector<8x32xf32>
    %370 = arith.mulf %369, %319 : vector<8x32xf32>
    %371 = vector.extract_strided_slice %366 {offsets = [0, 0], sizes = [8, 32], strides = [1, 1]} : vector<8x96xf32> to vector<8x32xf32>
    %372 = arith.mulf %371, %368 : vector<8x32xf32>
    %373 = arith.addf %370, %372 : vector<8x32xf32>
    %374 = vector.extract_strided_slice %366 {offsets = [0, 64], sizes = [8, 32], strides = [1, 1]} : vector<8x96xf32> to vector<8x32xf32>
    %375 = math.tanh %373 : vector<8x32xf32>
    %376 = arith.mulf %374, %375 : vector<8x32xf32>
    %377 = arith.index_cast %c6_i32 : i32 to index
    %c0_124 = arith.constant 0 : index
    %c0_125 = arith.constant 0 : index
    %378 = vector.load %arg18[%377, %c0_124, %c0_125] : memref<8x8x32xf32, #tpu.memory_space<vmem>>, vector<1x8x32xf32>
    %379 = vector.shape_cast %378 : vector<1x8x32xf32> to vector<8x32xf32>
    %380 = vector.shape_cast %376 : vector<8x32xf32> to vector<1x8x32xf32>
    tpu.vector_store %arg18[%377, %c0_124, %c0_125], %380 {strides = array<i32>} : memref<8x8x32xf32, #tpu.memory_space<vmem>>, vector<1x8x32xf32>,
    %c7_i32_126 = arith.constant 7 : i32
    %381 = arith.subi %c7_i32_126, %c6_i32 : i32
    %382 = arith.index_cast %381 : i32 to index
    %c0_127 = arith.constant 0 : index
    %c0_128 = arith.constant 0 : index
    %383 = vector.load %arg17[%382, %c0_127, %c0_128] : memref<8x8x128xf32, #tpu.memory_space<vmem>>, vector<1x8x128xf32>
    %384 = vector.shape_cast %383 : vector<1x8x128xf32> to vector<8x128xf32>
    %385 = arith.truncf %349 : vector<8x32xf32> to vector<8x32xbf16>
    %cst_129 = arith.constant dense<0.000000e+00> : vector<8x128xf32>
    %386 = tpu.matmul %385, %22, %cst_129 {dimension_numbers = #tpu.dot_dimension_numbers<[1], [0], [0], [1], [0, 0, 1, 1], [], []>} : vector<8x32xbf16>, vector<32x128xbf16>, vector<8x128xf32> -> vector<8x128xf32>
    %387 = arith.addf %384, %386 : vector<8x128xf32>
    %388 = vector.extract_strided_slice %387 {offsets = [0, 0], sizes = [8, 96], strides = [1, 1]} : vector<8x128xf32> to vector<8x96xf32>
    %389 = arith.negf %388 : vector<8x96xf32>
    %390 = math.exp %389 : vector<8x96xf32>
    %cst_130 = arith.constant 1.000000e+00 : f32
    %391 = vector.broadcast %cst_130 : f32 to vector<8x96xf32>
    %392 = arith.addf %391, %390 : vector<8x96xf32>
    %393 = arith.divf %391, %392 : vector<8x96xf32>
    %394 = vector.extract_strided_slice %387 {offsets = [0, 96], sizes = [8, 32], strides = [1, 1]} : vector<8x128xf32> to vector<8x32xf32>
    %395 = math.tanh %394 : vector<8x32xf32>
    %396 = vector.extract_strided_slice %393 {offsets = [0, 32], sizes = [8, 32], strides = [1, 1]} : vector<8x96xf32> to vector<8x32xf32>
    %397 = arith.mulf %396, %346 : vector<8x32xf32>
    %398 = vector.extract_strided_slice %393 {offsets = [0, 0], sizes = [8, 32], strides = [1, 1]} : vector<8x96xf32> to vector<8x32xf32>
    %399 = arith.mulf %398, %395 : vector<8x32xf32>
    %400 = arith.addf %397, %399 : vector<8x32xf32>
    %401 = vector.extract_strided_slice %393 {offsets = [0, 64], sizes = [8, 32], strides = [1, 1]} : vector<8x96xf32> to vector<8x32xf32>
    %402 = math.tanh %400 : vector<8x32xf32>
    %403 = arith.mulf %401, %402 : vector<8x32xf32>
    %c7_i32_131 = arith.constant 7 : i32
    %404 = arith.subi %c7_i32_131, %c6_i32 : i32
    %405 = arith.index_cast %404 : i32 to index
    %c0_132 = arith.constant 0 : index
    %c0_133 = arith.constant 0 : index
    %406 = vector.load %arg19[%405, %c0_132, %c0_133] : memref<8x8x32xf32, #tpu.memory_space<vmem>>, vector<1x8x32xf32>
    %407 = vector.shape_cast %406 : vector<1x8x32xf32> to vector<8x32xf32>
    %408 = vector.shape_cast %403 : vector<8x32xf32> to vector<1x8x32xf32>
    tpu.vector_store %arg19[%405, %c0_132, %c0_133], %408 {strides = array<i32>} : memref<8x8x32xf32, #tpu.memory_space<vmem>>, vector<1x8x32xf32>,
    %c7_i32_134 = arith.constant 7 : i32
    %409 = arith.index_cast %c7_i32_134 : i32 to index
    %c0_135 = arith.constant 0 : index
    %c0_136 = arith.constant 0 : index
    %410 = vector.load %arg16[%409, %c0_135, %c0_136] : memref<8x8x128xf32, #tpu.memory_space<vmem>>, vector<1x8x128xf32>
    %411 = vector.shape_cast %410 : vector<1x8x128xf32> to vector<8x128xf32>
    %412 = arith.truncf %376 : vector<8x32xf32> to vector<8x32xbf16>
    %cst_137 = arith.constant dense<0.000000e+00> : vector<8x128xf32>
    %413 = tpu.matmul %412, %21, %cst_137 {dimension_numbers = #tpu.dot_dimension_numbers<[1], [0], [0], [1], [0, 0, 1, 1], [], []>} : vector<8x32xbf16>, vector<32x128xbf16>, vector<8x128xf32> -> vector<8x128xf32>
    %414 = arith.addf %411, %413 : vector<8x128xf32>
    %415 = vector.extract_strided_slice %414 {offsets = [0, 0], sizes = [8, 96], strides = [1, 1]} : vector<8x128xf32> to vector<8x96xf32>
    %416 = arith.negf %415 : vector<8x96xf32>
    %417 = math.exp %416 : vector<8x96xf32>
    %cst_138 = arith.constant 1.000000e+00 : f32
    %418 = vector.broadcast %cst_138 : f32 to vector<8x96xf32>
    %419 = arith.addf %418, %417 : vector<8x96xf32>
    %420 = arith.divf %418, %419 : vector<8x96xf32>
    %421 = vector.extract_strided_slice %414 {offsets = [0, 96], sizes = [8, 32], strides = [1, 1]} : vector<8x128xf32> to vector<8x32xf32>
    %422 = math.tanh %421 : vector<8x32xf32>
    %423 = vector.extract_strided_slice %420 {offsets = [0, 32], sizes = [8, 32], strides = [1, 1]} : vector<8x96xf32> to vector<8x32xf32>
    %424 = arith.mulf %423, %373 : vector<8x32xf32>
    %425 = vector.extract_strided_slice %420 {offsets = [0, 0], sizes = [8, 32], strides = [1, 1]} : vector<8x96xf32> to vector<8x32xf32>
    %426 = arith.mulf %425, %422 : vector<8x32xf32>
    %427 = arith.addf %424, %426 : vector<8x32xf32>
    %428 = vector.extract_strided_slice %420 {offsets = [0, 64], sizes = [8, 32], strides = [1, 1]} : vector<8x96xf32> to vector<8x32xf32>
    %429 = math.tanh %427 : vector<8x32xf32>
    %430 = arith.mulf %428, %429 : vector<8x32xf32>
    %431 = arith.index_cast %c7_i32_134 : i32 to index
    %c0_139 = arith.constant 0 : index
    %c0_140 = arith.constant 0 : index
    %432 = vector.load %arg18[%431, %c0_139, %c0_140] : memref<8x8x32xf32, #tpu.memory_space<vmem>>, vector<1x8x32xf32>
    %433 = vector.shape_cast %432 : vector<1x8x32xf32> to vector<8x32xf32>
    %434 = vector.shape_cast %430 : vector<8x32xf32> to vector<1x8x32xf32>
    tpu.vector_store %arg18[%431, %c0_139, %c0_140], %434 {strides = array<i32>} : memref<8x8x32xf32, #tpu.memory_space<vmem>>, vector<1x8x32xf32>,
    %c7_i32_141 = arith.constant 7 : i32
    %435 = arith.subi %c7_i32_141, %c7_i32_134 : i32
    %436 = arith.index_cast %435 : i32 to index
    %c0_142 = arith.constant 0 : index
    %c0_143 = arith.constant 0 : index
    %437 = vector.load %arg17[%436, %c0_142, %c0_143] : memref<8x8x128xf32, #tpu.memory_space<vmem>>, vector<1x8x128xf32>
    %438 = vector.shape_cast %437 : vector<1x8x128xf32> to vector<8x128xf32>
    %439 = arith.truncf %403 : vector<8x32xf32> to vector<8x32xbf16>
    %cst_144 = arith.constant dense<0.000000e+00> : vector<8x128xf32>
    %440 = tpu.matmul %439, %22, %cst_144 {dimension_numbers = #tpu.dot_dimension_numbers<[1], [0], [0], [1], [0, 0, 1, 1], [], []>} : vector<8x32xbf16>, vector<32x128xbf16>, vector<8x128xf32> -> vector<8x128xf32>
    %441 = arith.addf %438, %440 : vector<8x128xf32>
    %442 = vector.extract_strided_slice %441 {offsets = [0, 0], sizes = [8, 96], strides = [1, 1]} : vector<8x128xf32> to vector<8x96xf32>
    %443 = arith.negf %442 : vector<8x96xf32>
    %444 = math.exp %443 : vector<8x96xf32>
    %cst_145 = arith.constant 1.000000e+00 : f32
    %445 = vector.broadcast %cst_145 : f32 to vector<8x96xf32>
    %446 = arith.addf %445, %444 : vector<8x96xf32>
    %447 = arith.divf %445, %446 : vector<8x96xf32>
    %448 = vector.extract_strided_slice %441 {offsets = [0, 96], sizes = [8, 32], strides = [1, 1]} : vector<8x128xf32> to vector<8x32xf32>
    %449 = math.tanh %448 : vector<8x32xf32>
    %450 = vector.extract_strided_slice %447 {offsets = [0, 32], sizes = [8, 32], strides = [1, 1]} : vector<8x96xf32> to vector<8x32xf32>
    %451 = arith.mulf %450, %400 : vector<8x32xf32>
    %452 = vector.extract_strided_slice %447 {offsets = [0, 0], sizes = [8, 32], strides = [1, 1]} : vector<8x96xf32> to vector<8x32xf32>
    %453 = arith.mulf %452, %449 : vector<8x32xf32>
    %454 = arith.addf %451, %453 : vector<8x32xf32>
    %455 = vector.extract_strided_slice %447 {offsets = [0, 64], sizes = [8, 32], strides = [1, 1]} : vector<8x96xf32> to vector<8x32xf32>
    %456 = math.tanh %454 : vector<8x32xf32>
    %457 = arith.mulf %455, %456 : vector<8x32xf32>
    %c7_i32_146 = arith.constant 7 : i32
    %458 = arith.subi %c7_i32_146, %c7_i32_134 : i32
    %459 = arith.index_cast %458 : i32 to index
    %c0_147 = arith.constant 0 : index
    %c0_148 = arith.constant 0 : index
    %460 = vector.load %arg19[%459, %c0_147, %c0_148] : memref<8x8x32xf32, #tpu.memory_space<vmem>>, vector<1x8x32xf32>
    %461 = vector.shape_cast %460 : vector<1x8x32xf32> to vector<8x32xf32>
    %462 = vector.shape_cast %457 : vector<8x32xf32> to vector<1x8x32xf32>
    tpu.vector_store %arg19[%459, %c0_147, %c0_148], %462 {strides = array<i32>} : memref<8x8x32xf32, #tpu.memory_space<vmem>>, vector<1x8x32xf32>,
    %c8_i32 = arith.constant 8 : i32
    %c0_149 = arith.constant 0 : index
    %c0_150 = arith.constant 0 : index
    %c0_151 = arith.constant 0 : index
    %463 = vector.load %arg14[%c0_149, %c0_150, %c0_151] : memref<2x8x32xf32, #tpu.memory_space<vmem>>, vector<1x8x32xf32>
    %464 = vector.shape_cast %463 : vector<1x8x32xf32> to vector<8x32xf32>
    %465 = vector.shape_cast %430 : vector<8x32xf32> to vector<1x8x32xf32>
    tpu.vector_store %arg14[%c0_149, %c0_150, %c0_151], %465 {strides = array<i32>} : memref<2x8x32xf32, #tpu.memory_space<vmem>>, vector<1x8x32xf32>,
    %c0_152 = arith.constant 0 : index
    %c0_153 = arith.constant 0 : index
    %c0_154 = arith.constant 0 : index
    %466 = vector.load %arg15[%c0_152, %c0_153, %c0_154] : memref<2x8x32xf32, #tpu.memory_space<vmem>>, vector<1x8x32xf32>
    %467 = vector.shape_cast %466 : vector<1x8x32xf32> to vector<8x32xf32>
    %468 = vector.shape_cast %427 : vector<8x32xf32> to vector<1x8x32xf32>
    tpu.vector_store %arg15[%c0_152, %c0_153, %c0_154], %468 {strides = array<i32>} : memref<2x8x32xf32, #tpu.memory_space<vmem>>, vector<1x8x32xf32>,
    %c1_155 = arith.constant 1 : index
    %c0_156 = arith.constant 0 : index
    %c0_157 = arith.constant 0 : index
    %469 = vector.load %arg14[%c1_155, %c0_156, %c0_157] : memref<2x8x32xf32, #tpu.memory_space<vmem>>, vector<1x8x32xf32>
    %470 = vector.shape_cast %469 : vector<1x8x32xf32> to vector<8x32xf32>
    %471 = vector.shape_cast %457 : vector<8x32xf32> to vector<1x8x32xf32>
    tpu.vector_store %arg14[%c1_155, %c0_156, %c0_157], %471 {strides = array<i32>} : memref<2x8x32xf32, #tpu.memory_space<vmem>>, vector<1x8x32xf32>,
    %c1_158 = arith.constant 1 : index
    %c0_159 = arith.constant 0 : index
    %c0_160 = arith.constant 0 : index
    %472 = vector.load %arg15[%c1_158, %c0_159, %c0_160] : memref<2x8x32xf32, #tpu.memory_space<vmem>>, vector<1x8x32xf32>
    %473 = vector.shape_cast %472 : vector<1x8x32xf32> to vector<8x32xf32>
    %474 = vector.shape_cast %454 : vector<8x32xf32> to vector<1x8x32xf32>
    tpu.vector_store %arg15[%c1_158, %c0_159, %c0_160], %474 {strides = array<i32>} : memref<2x8x32xf32, #tpu.memory_space<vmem>>, vector<1x8x32xf32>,
    %c0_161 = arith.constant 0 : index
    %c0_162 = arith.constant 0 : index
    %c0_163 = arith.constant 0 : index
    %475 = vector.load %arg18[%c0_161, %c0_162, %c0_163] : memref<8x8x32xf32, #tpu.memory_space<vmem>>, vector<8x8x32xf32>
    %476 = vector.shape_cast %475 : vector<8x8x32xf32> to vector<64x32xf32>
    %477 = arith.truncf %476 : vector<64x32xf32> to vector<64x32xbf16>
    %c0_164 = arith.constant 0 : index
    %c0_165 = arith.constant 0 : index
    %c0_166 = arith.constant 0 : index
    %478 = vector.load %arg19[%c0_164, %c0_165, %c0_166] : memref<8x8x32xf32, #tpu.memory_space<vmem>>, vector<8x8x32xf32>
    %479 = vector.shape_cast %478 : vector<8x8x32xf32> to vector<64x32xf32>
    %480 = arith.truncf %479 : vector<64x32xf32> to vector<64x32xbf16>
    %c0_167 = arith.constant 0 : index
    %c0_168 = arith.constant 0 : index
    %481 = vector.load %arg9[%c0_167, %c0_168] : memref<32x16xbf16, #tpu.memory_space<vmem>>, vector<32x16xbf16>
    %cst_169 = arith.constant dense<0.000000e+00> : vector<64x16xf32>
    %482 = tpu.matmul %477, %481, %cst_169 {dimension_numbers = #tpu.dot_dimension_numbers<[1], [0], [0], [1], [0, 0, 1, 1], [], []>} : vector<64x32xbf16>, vector<32x16xbf16>, vector<64x16xf32> -> vector<64x16xf32>
    %c0_170 = arith.constant 0 : index
    %c0_171 = arith.constant 0 : index
    %483 = vector.load %arg11[%c0_170, %c0_171] : memref<1x16xf32, #tpu.memory_space<vmem>>, vector<1x16xf32>
    %484 = vector.broadcast %483 : vector<1x16xf32> to vector<64x16xf32>
    %485 = arith.addf %482, %484 : vector<64x16xf32>
    %486 = vector.shape_cast %485 : vector<64x16xf32> to vector<8x8x16xf32>
    %c0_172 = arith.constant 0 : index
    %c0_173 = arith.constant 0 : index
    %c0_174 = arith.constant 0 : index
    %487 = vector.load %arg12[%c0_172, %c0_173, %c0_174] : memref<8x8x16xf32, #tpu.memory_space<vmem>>, vector<8x8x16xf32>
    tpu.vector_store %arg12[%c0_172, %c0_173, %c0_174], %486 {strides = array<i32>} : memref<8x8x16xf32, #tpu.memory_space<vmem>>, vector<8x8x16xf32>,
    %c0_175 = arith.constant 0 : index
    %c0_176 = arith.constant 0 : index
    %488 = vector.load %arg10[%c0_175, %c0_176] : memref<32x16xbf16, #tpu.memory_space<vmem>>, vector<32x16xbf16>
    %cst_177 = arith.constant dense<0.000000e+00> : vector<64x16xf32>
    %489 = tpu.matmul %480, %488, %cst_177 {dimension_numbers = #tpu.dot_dimension_numbers<[1], [0], [0], [1], [0, 0, 1, 1], [], []>} : vector<64x32xbf16>, vector<32x16xbf16>, vector<64x16xf32> -> vector<64x16xf32>
    %490 = vector.shape_cast %489 : vector<64x16xf32> to vector<8x8x16xf32>
    %c0_178 = arith.constant 0 : index
    %c0_179 = arith.constant 0 : index
    %c0_180 = arith.constant 0 : index
    %491 = vector.load %arg13[%c0_178, %c0_179, %c0_180] : memref<8x8x16xf32, #tpu.memory_space<vmem>>, vector<8x8x16xf32>
    tpu.vector_store %arg13[%c0_178, %c0_179, %c0_180], %490 {strides = array<i32>} : memref<8x8x16xf32, #tpu.memory_space<vmem>>, vector<8x8x16xf32>,
    return
  }
  func.func @transform_0(%arg0: i32) -> (i32, i32, i32) {
    %c0_i32 = arith.constant 0 : i32
    %c0_i32_0 = arith.constant 0 : i32
    %c0_i32_1 = arith.constant 0 : i32
    return %arg0, %c0_i32, %c0_i32_0 : i32, i32, i32
  }
  func.func @transform_1(%arg0: i32) -> (i32, i32, i32) {
    %c1_i32 = arith.constant 1 : i32
    %0 = arith.subi %c1_i32, %arg0 : i32
    %c0_i32 = arith.constant 0 : i32
    %c0_i32_0 = arith.constant 0 : i32
    %c0_i32_1 = arith.constant 0 : i32
    return %0, %c0_i32, %c0_i32_0 : i32, i32, i32
  }
  func.func @transform_2(%arg0: i32) -> (i32, i32) {
    %c0_i32 = arith.constant 0 : i32
    %c0_i32_0 = arith.constant 0 : i32
    %c0_i32_1 = arith.constant 0 : i32
    return %c0_i32, %c0_i32_0 : i32, i32
  }
  func.func @transform_3(%arg0: i32) -> (i32, i32) {
    %c0_i32 = arith.constant 0 : i32
    %c0_i32_0 = arith.constant 0 : i32
    %c0_i32_1 = arith.constant 0 : i32
    return %c0_i32, %c0_i32_0 : i32, i32
  }
  func.func @transform_4(%arg0: i32) -> (i32, i32) {
    %c0_i32 = arith.constant 0 : i32
    %c0_i32_0 = arith.constant 0 : i32
    %c0_i32_1 = arith.constant 0 : i32
    return %c0_i32, %c0_i32_0 : i32, i32
  }
  func.func @transform_5(%arg0: i32) -> (i32, i32) {
    %c0_i32 = arith.constant 0 : i32
    %c0_i32_0 = arith.constant 0 : i32
    %c0_i32_1 = arith.constant 0 : i32
    return %c0_i32, %c0_i32_0 : i32, i32
  }
  func.func @transform_6(%arg0: i32) -> (i32, i32) {
    %c0_i32 = arith.constant 0 : i32
    %c0_i32_0 = arith.constant 0 : i32
    %c0_i32_1 = arith.constant 0 : i32
    return %c0_i32, %c0_i32_0 : i32, i32
  }
  func.func @transform_7(%arg0: i32) -> (i32, i32) {
    %c0_i32 = arith.constant 0 : i32
    %c0_i32_0 = arith.constant 0 : i32
    %c0_i32_1 = arith.constant 0 : i32
    return %c0_i32, %c0_i32_0 : i32, i32
  }
  func.func @transform_8(%arg0: i32) -> (i32, i32) {
    %c0_i32 = arith.constant 0 : i32
    %c0_i32_0 = arith.constant 0 : i32
    %c0_i32_1 = arith.constant 0 : i32
    return %c0_i32, %c0_i32_0 : i32, i32
  }
  func.func @transform_9(%arg0: i32) -> (i32, i32) {
    %c0_i32 = arith.constant 0 : i32
    %c0_i32_0 = arith.constant 0 : i32
    %c0_i32_1 = arith.constant 0 : i32
    return %c0_i32, %c0_i32_0 : i32, i32
  }
  func.func @transform_10(%arg0: i32) -> (i32, i32) {
    %c0_i32 = arith.constant 0 : i32
    %c0_i32_0 = arith.constant 0 : i32
    %c0_i32_1 = arith.constant 0 : i32
    return %c0_i32, %c0_i32_0 : i32, i32
  }
  func.func @transform_11(%arg0: i32) -> (i32, i32, i32) {
    %c0_i32 = arith.constant 0 : i32
    %c0_i32_0 = arith.constant 0 : i32
    %c0_i32_1 = arith.constant 0 : i32
    return %arg0, %c0_i32, %c0_i32_0 : i32, i32, i32
  }
  func.func @transform_12(%arg0: i32) -> (i32, i32, i32) {
    %c1_i32 = arith.constant 1 : i32
    %0 = arith.subi %c1_i32, %arg0 : i32
    %c0_i32 = arith.constant 0 : i32
    %c0_i32_0 = arith.constant 0 : i32
    %c0_i32_1 = arith.constant 0 : i32
    return %0, %c0_i32, %c0_i32_0 : i32, i32, i32
  }
}

</mosaic_0001>

<bundles_post_ra>
// kernel: tpu_custom_call.1
= control target key start
LH: loop header
LB: loop body
LE: loop exit
PB: predicated region body
PF: predicated region fallthrough
CT: control target
= control target key end

     0   :  { %s4384_s0 = inlined_call_operand.hbm [shape: bf16[16,8,32], index: 0, kind: input, shape index: {}]   ;;  %s4385_s1 = inlined_call_operand.hbm [shape: bf16[16,8,32], index: 1, kind: input, shape index: {}]   ;;  %s4386_s2 = inlined_call_operand.vmem [shape: bf16[32,128], index: 2, kind: input, shape index: {}]   ;;  %s4387_s3 = inlined_call_operand.vmem [shape: bf16[32,128], index: 3, kind: input, shape index: {}]   ;;  %s4388_s4 = inlined_call_operand.hbm [shape: f32[1,128], index: 4, kind: input, shape index: {}]   ;;  %s4389_s5 = inlined_call_operand.hbm [shape: f32[1,128], index: 5, kind: input, shape index: {}]   ;;  %s4390_s6 = inlined_call_operand.vmem [shape: bf16[32,128], index: 6, kind: input, shape index: {}]   ;;  %s4391_s7 = inlined_call_operand.hbm [shape: bf16[32,128], index: 7, kind: input, shape index: {}]   ;;  %s4392_s8 = inlined_call_operand.vmem [shape: bf16[32,16], index: 8, kind: input, shape index: {}]   ;;  %s4393_s9 = inlined_call_operand.vmem [shape: bf16[32,16], index: 9, kind: input, shape index: {}]   ;;  %s4394_s10 = inlined_call_operand.vmem [shape: f32[1,16], index: 10, kind: input, shape index: {}]   ;;  %s4395_s11 = inlined_call_operand.hbm [shape: f32[16,8,16], index: 11, kind: output, shape index: {0}]   ;;  %s4396_s12 = inlined_call_operand.hbm [shape: f32[16,8,16], index: 12, kind: output, shape index: {1}]  }
   0x1   :  { %4420 = sst [smem:[#allocation35_spill]] %s4384_s0 }
   0x2   :  { %4421 = sst [smem:[#allocation36_spill]] %s4388_s4 }
   0x3   :  { %4422 = sst [smem:[#allocation37_spill]] %s4389_s5 }
   0x4   :  { %4423 = sst [smem:[#allocation38_spill]] %s4391_s7 }
   0x5   :  { %4424 = sst [smem:[#allocation39_spill]] %s4395_s11 }
   0x6   :  { %4425 = sst [smem:[#allocation40_spill]] %s4396_s12 }
   0x7   :  { %18 = vsyncpa [#allocation9], 0 }
   0x8   :  { %20 = vsyncpa [#allocation9 + $0x1], 0 }
   0x9   :  { %21 = vsyncpa [#allocation12], 0 }
   0xa   :  { %23 = vsyncpa [#allocation12 + $0x1], 0 }
   0xb   :  { %24 = vsyncpa [#allocation15], 0 }
   0xc   :  { %25 = vsyncpa [#allocation10], 0 }
   0xd   :  { %27 = vsyncpa [#allocation10 + $0x1], 0 }
   0xe   :  { %28 = vsyncpa [#allocation19], 0 }
   0xf   :  { %30 = vsyncpa [#allocation19 + $0x1], 0  ;;  %s3539_s21 = smov 0   ;;  %s3541_s22 = smov 0  }
  0x10   :  { %s3543_s23 = smov 0   ;;  %s3545_s24 = smov 0  }
  0x11   :  { %s3547_s25 = smov 0   ;;  %s3549_s26 = smov 0  }
  0x12   :  { %s3551_s27 = smov 0  }
  0x13 LB: > { %4426 = sst [smem:[#allocation26_spill]] %s3431_s21  ;;  %s3575_s28 = sadd.s32 4294967295, %s3455_s27   ;;  %s3455_s27 = sphi %s3551_s27, %s4479_s27   ;;  %s3451_s26 = sphi %s3549_s26, %s4482_s26   ;;  %s3447_s25 = sphi %s3547_s25, %s4487_s25   ;;  %s3443_s24 = sphi %s3545_s24, %s4486_s24   ;;  %s3439_s23 = sphi %s3543_s23, %s4485_s23   ;;  %s3435_s22 = sphi %s3541_s22, %s4484_s22   ;;  %s3431_s21 = sphi %s3539_s21, %s4483_s21  }
  0x14   : > { %4427 = sst [smem:[#allocation27_spill]] %s3443_s24  ;;  %s2570_s29 = sadd.s32 4294967294, %s3455_s27  }
  0x15   : > { %4428 = sst [smem:[#allocation28_spill]] %s3451_s26  ;;  %p56_p0 = scmp.ne.s32.totalorder %s3447_s25, %s3443_s24 }
  0x16   : > { %p4399_p1 = scmp.eq.s32.totalorder %s3575_s28, 0  ;;  %p84_p2 = scmp.ne.s32.totalorder %s3435_s22, %s3431_s21 }
  0x17   : > { %p303_p5 = scmp.eq.s32.totalorder %s2570_s29, 1  ;;  %p2571_p7 = scmp.ge.s32.totalorder %s3455_s27, 1 }
  0x18   : > { %p3586_p4 = por %p4399_p1, %p56_p0  ;;  %p3592_p6 = por %p84_p2, %p4399_p1 }
  0x19   : > { %p3597_p8 = por %p303_p5, %p56_p0  ;;  %p3601_p9 = por %p303_p5, %p84_p2 }
  0x1a   : > { %s4429_s30 = scalar_select %p3586_p4, 1, 0 }
  0x1b   : > { %s4430_s13 = scalar_select %p3592_p6, 1, 0 }
  0x1c   : > { %s4431_s14 = scalar_select %p3597_p8, 1, 0 }
  0x1d   : > { %s4433_s15 = scalar_select %p3601_p9, 1, 0 }
  0x1e   : > { %4432 = sst [smem:[#allocation29_spill]] %s4431_s14  ;;  %p338_p10 = scmp.lt.s32.totalorder %s3455_s27, 3 }
  0x1f   : > { %4434 = sst [smem:[#allocation30_spill]] %s4433_s15  ;;  %s3457_s17 = smov [#allocation13]  }
  0x20   : > { %p3608_p13 = pnand %p2571_p7, %p338_p10  ;;  %s357_s18 = sshll.u32 %s3457_s17, 4  ;;  %s358_s18 = int_to_ptr.vmem [resolvable:$true] %s357_s18 }
  0x21   : > { %s3458_s19 = smov [#allocation14]   ;;  %s3459_s15 = smov [#allocation16]  }
  0x22   : > { %s4435_s16 = scalar_select %p3608_p13, 1, 0 }
  0x23   : > { %p2942_p0 = pneg %p3608_p13  ;;  %s368_s20 = sshll.u32 %s3458_s19, 4  ;;  %s369_s20 = int_to_ptr.vmem [resolvable:$true] %s368_s20 }
  0x24   : > { %s381_s21 = sshll.u32 %s3459_s15, 4  ;;  %s3202_s17 = scalar_lea.vmem %s358_s18, 16  ;;  %s3620_s21 = int_to_ptr.vmem [resolvable:$true] %s381_s21 }
  0x25   : > { %p3616_p2 = pnand %p2942_p0, %p4399_p1  ;;  %p3203_p7 = scmp.ne.s32.totalorder %s358_s18, %s3202_s17 }
  0x26   : > { %s3209_s19 = scalar_lea.vmem %s358_s18, 32  ;;  %p3210_p11 = scmp.lt.s32.totalorder %s358_s18, %s358_s18 }
  0x27   : > { %p3193_p5 = pneg %p3616_p2  ;;  %p3211_p0 = scmp.lt.s32.totalorder %s3209_s19, %s3202_s17 }
  0x29   : > { %p3205_p10 = pnand %p3203_p7, %p3193_p5  ;;  %p3212_p1 = por %p3211_p0, %p3210_p11 }
  0x2b   : > { %p3206_p12 = pneg %p3205_p10 }
  0x2d   : > { %p3213_p3 = pnand %p3212_p1, %p3206_p12 }
  0x2f   : > { %3216 = shalt.err (!%p3213_p3)
}
  0x30   : > { %s4437_s4 = sld [smem:[#allocation36_spill]]  ;;  %s3228_s24 = scalar_lea.vmem %s369_s20, 16 }
  0x31   : > { %p3229_p9 = scmp.ne.s32.totalorder %s369_s20, %s3228_s24  ;;  %s3235_s12 = scalar_lea.vmem %s369_s20, 32 }
  0x32   : > { %p3236_p10 = scmp.lt.s32.totalorder %s369_s20, %s369_s20  ;;  %p3237_p6 = scmp.lt.s32.totalorder %s3235_s12, %s3228_s24 }
  0x33   : > { %p3231_p8 = pnand %p3229_p9, %p3193_p5 }
  0x34   : > { %p3238_p4 = por %p3237_p6, %p3236_p10 }
  0x35   : > { %p3232_p7 = pneg %p3231_p8 }
  0x36   : > { %2945 = dma.hbm_to_vmem [thread:$0]  (!%p3616_p2), %s4437_s4, 16, %s358_s18, [#allocation12]  }
  0x37   : > { %p3239_p11 = pnand %p3238_p4, %p3232_p7 }
  0x39   : > { %3242 = shalt.err (!%p3239_p11)
}
  0x3a   : > { %s4438_s5 = sld [smem:[#allocation37_spill]]  ;;  %s3254_s14 = scalar_lea.vmem %s3620_s21, 256 }
  0x3b   : > { %p3255_p1 = scmp.ne.s32.totalorder %s3620_s21, %s3254_s14  ;;  %p3262_p6 = scmp.lt.s32.totalorder %s3620_s21, %s3620_s21 }
  0x3c   : > { %p3263_p4 = scmp.lt.s32.totalorder %s3254_s14, %s3254_s14 }
  0x3d   : > { %p3257_p3 = pnand %p3255_p1, %p3193_p5 }
  0x3e   : > { %p3264_p9 = por %p3263_p4, %p3262_p6 }
  0x3f   : > { %p3258_p8 = pneg %p3257_p3 }
  0x40   : > { %2948 = dma.hbm_to_vmem [thread:$0]  (!%p3616_p2), %s4438_s5, 16, %s369_s20, [#allocation15]  }
  0x41   : > { %p3265_p12 = pnand %p3264_p9, %p3258_p8 }
  0x43   : > { %3268 = shalt.err (!%p3265_p12)
}
  0x44   : > { %s4406_s12 = smov 64   ;;  %s4409_s24 = smov 4  }
  0x45   : > { %s4439_s7 = sld [smem:[#allocation38_spill]]  ;;  %p4411_p5 = scmp.eq.s32.totalorder %s3455_s27, 0 }
  0x46   : > { %p4408_p0 = scmp.lt.s32.totalorder %s3455_s27, 2  ;;  %p50_p7 = scmp.ne.s32.totalorder %s3451_s26, %s3447_s25 }
  0x47   : > { %s404_s17 = sand.u32 1, %s3451_s26   ;;  %s2670_s19 = sshll.u32 %s3455_s27, 9 }
  0x48   : > { %p52_p10 = por %p4411_p5, %p50_p7  ;;  %p4440_p11 = scmp.eq.s32.totalorder %s3575_s28, 1 }
  0x49   : > { %s2576_s29 = sshll.u32 %s404_s17, 5  ;;  %s4443_s0 = sld [smem:[#allocation35_spill]] }
  0x4a   : > { %p3667_p1 = por %p4440_p11, %p50_p7  ;;  %s3684_s15 = scalar_lea.sflag [#allocation9], %s404_s17 }
  0x4b   : > { %2951 = dma.hbm_to_vmem [thread:$0]  (!%p3616_p2), %s4439_s7, 256, %s3620_s21, [#allocation15], %s4406_s12, %s4406_s12, %s4409_s24  }
  0x4c   : > { %s4441_s14 = scalar_select %p3667_p1, 1, 0 }
  0x4d   : > { %s408_s21 = scalar_lea.vmem [#allocation8], %s2576_s29  ;;  %p3678_p2 = pnand %p4408_p0, %p52_p10 }
  0x4e   : > { %4442 = sst [smem:[#allocation31_spill]] %s4441_s14  ;;  %s415_s18 = sshll.u32 %s408_s21, 4  ;;  %s3682_s18 = int_to_ptr.vmem [resolvable:$true] %s415_s18 }
  0x4f   : > { %s3674_s11 = scalar_lea.hbm %s4443_s0, %s2670_s19  ;;  %p3271_p8 = pneg %p3678_p2 }
  0x50   : > { %s3269_s12 = scalar_lea.hbm %s3674_s11, 512  ;;  %s3274_s19 = scalar_lea.hbm %s4443_s0, 1024 }
  0x51   : > { %p3270_p3 = scmp.ne.s32.totalorder %s3674_s11, %s3269_s12  ;;  %p3275_p9 = scmp.lt.s32.totalorder %s3674_s11, %s4443_s0 }
  0x52   : > { %p3276_p12 = scmp.lt.s32.totalorder %s3274_s19, %s3269_s12 }
  0x53   : > { %p3272_p6 = pnand %p3271_p8, %p3270_p3 }
  0x54   : > { %p3277_p7 = por %p3276_p12, %p3275_p9 }
  0x55   : > { %p3273_p4 = pneg %p3272_p6 }
  0x57   : > { %p3278_p10 = pnand %p3277_p7, %p3273_p4 }
  0x59   : > { %3281 = shalt.err (!%p3278_p10)
}
  0x5a   : > { %s3282_s17 = scalar_lea.vmem %s3682_s18, 512  ;;  %s3462_s24 = smov [#allocation8]  }
  0x5b   : > { %p3283_p11 = scmp.ne.s32.totalorder %s3682_s18, %s3282_s17  ;;  %s3287_s7 = sshll.u32 %s3462_s24, 4  ;;  %s3288_s7 = int_to_ptr.vmem [resolvable:$false] %s3287_s7 }
  0x5c   : > { %s3289_s4 = scalar_lea.vmem %s3288_s7, 1024  ;;  %p3290_p6 = scmp.lt.s32.totalorder %s3682_s18, %s3288_s7 }
  0x5d   : > { %p3285_p0 = pnand %p3283_p11, %p3271_p8  ;;  %p3291_p5 = scmp.lt.s32.totalorder %s3289_s4, %s3282_s17 }
  0x5f   : > { %p3286_p3 = pneg %p3285_p0  ;;  %p3292_p1 = por %p3291_p5, %p3290_p6 }
  0x61   : > { %p3293_p13 = pnand %p3292_p1, %p3286_p3 }
  0x63   : > { %3296 = shalt.err (!%p3293_p13)
}
  0x64   : > { %s4445_s12 = smov 4   ;;  %s4446_s5 = smov 64  }
  0x65   : > { %2955 = dma.hbm_to_vmem [thread:$0]  (!%p3678_p2), %s3674_s11, 512, %s3682_s18, %s3684_s15, %s4446_s5, %s4446_s5, %s4445_s12  }
  0x66   : > { %s3709_s7 = sadd.s32 1, %s3455_s27   ;;  %s66_s24 = ssub.s32 1, %s3455_s27 }
  0x67   : > { %4447 = sst [smem:[#allocation32_spill]] %s3709_s7  ;;  %s40_s20 = ssub.s32 %s3455_s27, %s3709_s7 }
  0x68   : > { %s67_s19 = ssub.s32 1, %s3709_s7  ;;  %p41_p13 = scmp.eq.s32.totalorder %s40_s20, 0 }
  0x69   : > { %s68_s29 = ssub.s32 %s66_s24, %s67_s19  ;;  %s71_s21 = sadd.s32 1, %s3439_s23 }
  0x6a   : > { %p69_p5 = scmp.eq.s32.totalorder %s68_s29, 0  ;;  %s4448_s17 = sadd.s32 1, %s3451_s26 }
  0x6b   : > { %s3719_s4 = scalar_select %p41_p13, %s3451_s26, %s4448_s17  }
  0x6c   : > { %s3722_s0 = scalar_select %p69_p5, %s3439_s23, %s71_s21  }
  0x6d   : > { %4449 = sst [smem:[#allocation33_spill]] %s3719_s4  ;;  %p78_p0 = scmp.ne.s32.totalorder %s3439_s23, %s3435_s22 }
  0x6e   : > { %4450 = sst [smem:[#allocation34_spill]] %s3722_s0  ;;  %s425_s14 = sand.u32 1, %s3455_s27  }
  0x6f   : > { %s427_s11 = sand.u32 1, %s3439_s23   ;;  %p4451_p1 = scmp.eq.s32.totalorder %s3455_s27, 0 }
  0x70   : > { %p4452_p8 = scmp.eq.s32.totalorder %s3575_s28, 1  ;;  %s2579_s18 = sshll.u32 %s427_s11, 5 }
  0x71   : > { %p80_p2 = por %p78_p0, %p4451_p1  ;;  %s2671_s20 = sshll.u32 %s66_s24, 9 }
  0x72   : > { %p3732_p4 = por %p4452_p8, %p78_p0  ;;  %s3739_s7 = scalar_lea.hbm %s4385_s1, %s2671_s20 }
  0x73   : > { %s429_s21 = scalar_lea.vmem [#allocation11], %s2579_s18  ;;  %p4454_p9 = scmp.lt.s32.totalorder %s3455_s27, 2 }
  0x74   : > { %s4453_s15 = scalar_select %p3732_p4, 1, 0 }
  0x75   : > { %s437_s17 = sshll.u32 %s429_s21, 4  ;;  %p3743_p12 = pnand %p4454_p9, %p80_p2  ;;  %s3747_s17 = int_to_ptr.vmem [resolvable:$true] %s437_s17 }
  0x76   : > { %s3749_s11 = scalar_lea.sflag [#allocation12], %s425_s14  ;;  %s3297_s24 = scalar_lea.hbm %s3739_s7, 512 }
  0x77   : > { %p3298_p7 = scmp.ne.s32.totalorder %s3739_s7, %s3297_s24  ;;  %p3299_p10 = pneg %p3743_p12 }
  0x78   : > { %s3302_s18 = scalar_lea.hbm %s4385_s1, 1024  ;;  %p3303_p6 = scmp.lt.s32.totalorder %s3739_s7, %s4385_s1 }
  0x79   : > { %p3300_p11 = pnand %p3299_p10, %p3298_p7  ;;  %p3304_p13 = scmp.lt.s32.totalorder %s3302_s18, %s3297_s24 }
  0x7b   : > { %p3301_p3 = pneg %p3300_p11  ;;  %p3305_p5 = por %p3304_p13, %p3303_p6 }
  0x7d   : > { %p3306_p0 = pnand %p3305_p5, %p3301_p3 }
  0x7f   : > { %3309 = shalt.err (!%p3306_p0)
}
  0x80   : > { %s3310_s14 = scalar_lea.vmem %s3747_s17, 512  ;;  %s3463_s26 = smov [#allocation11]  }
  0x81   : > { %p3311_p1 = scmp.ne.s32.totalorder %s3747_s17, %s3310_s14  ;;  %s3315_s0 = sshll.u32 %s3463_s26, 4  ;;  %s3316_s0 = int_to_ptr.vmem [resolvable:$false] %s3315_s0 }
  0x82   : > { %s3317_s20 = scalar_lea.vmem %s3316_s0, 1024  ;;  %p3318_p9 = scmp.lt.s32.totalorder %s3747_s17, %s3316_s0 }
  0x83   : > { %p3313_p2 = pnand %p3311_p1, %p3299_p10  ;;  %p3319_p7 = scmp.lt.s32.totalorder %s3317_s20, %s3310_s14 }
  0x85   : > { %p3314_p8 = pneg %p3313_p2  ;;  %p3320_p11 = por %p3319_p7, %p3318_p9 }
  0x87   : > { %p3321_p4 = pnand %p3320_p11, %p3314_p8 }
  0x89   : > { %3324 = shalt.err (!%p3321_p4)
}
  0x8a   : > { %2958 = dma.hbm_to_vmem [thread:$0]  (!%p3743_p12), %s3739_s7, 512, %s3747_s17, %s3749_s11, %s4446_s5, %s4446_s5, %s4445_s12  }
  0x8b   : > { %p4456_p10 = scmp.ne.s32.totalorder %s4435_s16, 0 }
  0x8c   : > { %s3776_s26 = sand.u32 (!%p4456_p10), 1, %s3447_s25   ;;  %p4457_p4 = scmp.ne.s32.totalorder (!%p4456_p10), %s4429_s30, 0 }
  0x8d   : > { %449 = sbr.rel (%p4456_p10) target bundleno = 5984 (0x1760), region = 64  ;;  %s2583_s0 = sshll.u32 (!%p4456_p10), %s3776_s26, 5 }
  0x8e   : > { %s452_s24 = scalar_lea.sflag (!%p4456_p10), [#allocation9], %s3776_s26  ;;  %s3780_s19 = scalar_lea.vmem (!%p4456_p10), [#allocation8], %s2583_s0 }
  0x92   : > { %3406 = dma.done.wait (%p4457_p4), %s452_s24, 512  }
  0x93   : > { %3408 = vsyncadd (%p4457_p4), %s452_s24, 4294966784  ;;  %s460_s16 = sand.u32 1, %s3575_s28   ;;  %s3788_s12 = sand.u32 1, %s3435_s22  }
  0x94   : > { %s2584_s5 = sshll.u32 %s3788_s12, 5  ;;  %s461_s7 = scalar_lea.sflag [#allocation12], %s460_s16 }
  0x95   : > { %s3791_s4 = scalar_lea.vmem [#allocation11], %s2584_s5  ;;  %p4458_p12 = scmp.ne.s32.totalorder %s4430_s13, 0 }
  0x97   : > { %3410 = dma.done.wait (%p4458_p12), %s461_s7, 512  }
  0x98   : > { %3412 = vsyncadd (%p4458_p12), %s461_s7, 4294966784  ;;  %p4459_p3 = scmp.eq.s32.totalorder %s3575_s28, 0 }
  0x9a   : > { %3414 = dma.done.wait (%p4459_p3), [#allocation12], 16   ;;  %p4460_p6 = pmov %p4459_p3 }
  0x9b   : > { %p4461_p13 = pmov %p4459_p3 }
  0x9c   : > { %3416 = vsyncadd (%p4460_p6), [#allocation12], 4294967280 }
  0x9d   : > { %3418 = dma.done.wait (%p4461_p13), [#allocation15], 272   ;;  %p4462_p5 = pmov %p4459_p3 }
  0x9e   : > { %s2588_s30 = sshll.u32 %s3776_s26, 6  ;;  %s2589_s17 = sshll.u32 %s3788_s12, 6 }
  0x9f   : > { %3420 = vsyncadd (%p4462_p5), [#allocation15], 4294967024  ;;  %s3807_s11 = scalar_lea.vmem [#allocation17], %s2588_s30  ;;  %s3809_s13 = scalar_lea.vmem [#allocation18], %s2589_s17 }
  0xa0   : > { %p4463_p0 = scmp.ne.s32.totalorder %s3575_s28, 0 }
  0xa2   : > { %537 = sbr.rel (%p4463_p0) target bundleno = 170 (0xaa), region = 88 }
  0xa7   : > { %vm538_vm0 = vcmask 261120   ;;  %v3464_v0 = vmov 0.0  }
  0xa8   : > { %539 = vst.msk [vmem:[#allocation2] sm:$0xff] %vm538_vm0, %v3464_v0  ;;  %540 = vst.msk [vmem:[#allocation2 + $0x8] sm:$0xff] %vm538_vm0, %v3464_v0 }
  0xa9   : > { %541 = vst.msk [vmem:[#allocation3] sm:$0xff] %vm538_vm0, %v3464_v0  ;;  %542 = vst.msk [vmem:[#allocation3 + $0x8] sm:$0xff] %vm538_vm0, %v3464_v0 }
  0xaa PF: > { %v3043_v1 = vld [vmem:[%s4386_s2 + $0x8] sm:$0xff]   ;;  %v3045_v3 = vld [vmem:[%s4386_s2] sm:$0xff]   ;;  %vm602_vm1 = vcmask 261120   ;;  %v3465_v10 = vmov 0.0   ;;  %v3052_v11 = vld [vmem:[%s3780_s19 + $0x10] sm:$0xff]   ;;  %vm3467_vm2 = vmmov 0  }
  0xab   : > { %v3044_v2 = vld [vmem:[%s4387_s3 + $0x8] sm:$0xff]   ;;  %2746 = vmatprep.subr.bf16.mxu0 %v3043_v1  ;;  %v3046_v4 = vld [vmem:[%s4387_s3] sm:$0xff]   ;;  %v3053_v12 = vld [vmem:[%s3791_s4 + $0x10] sm:$0xff]   ;;  %s3469_s20 = smov 96   ;;  %vm2268_vm3 = vcmask 130048   ;;  %s2672_s17 = sshll.u32 %s3575_s28, 10 }
  0xac   : > { %2758 = vmatprep.subr.bf16.mxu1 %v3044_v2  ;;  %2747 = vmatpush3.bf16.msra.mxu0 %v3043_v1  ;;  %v3047_v5 = vld [vmem:[%s3780_s19] sm:$0xff]   ;;  %v3049_v7 = vld [vmem:[%s3780_s19 + $0x8] sm:$0xff]   ;;  %v3054_v13 = vld [vmem:[%s3780_s19 + $0x18] sm:$0xff]   ;;  %s3466_s19 = smov 32   ;;  %s4464_s21 = sld [smem:[#allocation39_spill]] }
  0xad   : > { %2759 = vmatpush3.bf16.msra.mxu1 %v3044_v2  ;;  %2748 = vmatprep.subr.bf16.mxu0 %v3045_v3  ;;  %v3048_v6 = vld [vmem:[%s3791_s4] sm:$0xff]   ;;  %v3050_v8 = vld [vmem:[%s3791_s4 + $0x8] sm:$0xff]   ;;  %v3055_v14 = vld [vmem:[%s3791_s4 + $0x18] sm:$0xff]   ;;  %s3468_s4 = smov 64   ;;  %s2414_s24 = sshll.u32 %s3809_s13, 4  ;;  %s4298_s24 = int_to_ptr.vmem [resolvable:$true] %s2414_s24 }
  0xae   : > { %2760 = vmatprep.subr.bf16.mxu1 %v3046_v4  ;;  %2750 = vmatprep.mubr.msk.bf16.mxu0 %vm602_vm1, %v3047_v5  ;;  %v3831_v9 = vld [vmem:[#allocation16 + $0x8] sm:$0xff]   ;;  %v3850_v16 = vld [vmem:[#allocation16] sm:$0xff]   ;;  %v2591_v23 = vld [vmem:[#allocation13] ss:$0 sm:$0xff]  ;;  %s4467_s7 = sld [smem:[#allocation40_spill]]  ;;  %s3470_s18 = smov [#allocation17]  }
  0xaf   : > { %2762 = vmatprep.mubr.msk.bf16.mxu1 %vm602_vm1, %v3048_v6  ;;  %v3848_v15 = vld [vmem:[%s4390_s6 + $0x8] sm:$0xff]   ;;  %v3856_v17 = vld [vmem:[%s4390_s6] sm:$0xff]   ;;  %s3329_s29 = sshll.u32 %s3470_s18, 4  ;;  %s3330_s29 = int_to_ptr.vmem [resolvable:$false] %s3329_s29 }
  0xb0   : > { %2749 = vmatpush3.bf16.msra.mxu0 %v3045_v3  ;;  %v829_v18 = vld [vmem:[#allocation3 + $0x8] sm:$0xff]  ;;  %v824_v19 = vld [vmem:[#allocation2] sm:$0xff]  ;;  %v827_v20 = vld [vmem:[#allocation2 + $0x8] sm:$0xff] }
  0xb1   : > { %2761 = vmatpush3.bf16.msra.mxu1 %v3046_v4  ;;  %2770 = vmatprep.subr.bf16.mxu0 %v3465_v10  ;;  %v831_v21 = vpack.c.bf16 %v824_v19, %v824_v19  ;;  %v923_v22 = vpack.c.bf16 %v827_v20, %v827_v20  ;;  %v2602_v24 = vld [vmem:[#allocation14] ss:$0 sm:$0xff]  ;;  %v825_v5 = vld [vmem:[#allocation3] sm:$0xff] }
  0xb2   : > { %2778 = vmatprep.subr.bf16.mxu1 %v3465_v10  ;;  %988 = vrot.lane.b32.xlu1 %v829_v18, %s3466_s19  ;;  %s4465_s14 = smov %s4464_s21 }
  0xb3   : > { %2751 = vmatmul.mubr.msk.bf16.vlgmr.msra.gmra.mxu0 %vm602_vm1, %v3049_v7 }
  0xb4   : > { %2763 = vmatmul.mubr.msk.bf16.vlgmr.msra.gmra.mxu1 %vm602_vm1, %v3050_v8  ;;  %2754 = vmatprep.mubr.msk.bf16.mxu0 %vm602_vm1, %v3052_v11 }
  0xb5   : > { %2779 = vmatpush3.bf16.msra.mxu1 %v3831_v9  ;;  %2766 = vmatprep.mubr.msk.bf16.mxu1 %vm602_vm1, %v3053_v12 }
  0xb6   : > { %2780 = vmatprep.subr.bf16.mxu1 %v3465_v10  ;;  %2771 = vmatpush3.bf16.msra.mxu0 %v3848_v15 }
  0xb7   : > { %2772 = vmatprep.subr.bf16.mxu0 %v3465_v10 }
  0xb9   : > { %2781 = vmatpush3.bf16.msra.mxu1 %v3850_v16 }
  0xba   : > { %2794 = vmatprep.subr.bf16.mxu1 %v3465_v10  ;;  %2773 = vmatpush3.bf16.msra.mxu0 %v3856_v17 }
  0xbb   : > { %2755 = vmatmul.mubr.msk.bf16.gmra.mxu0 %vm602_vm1, %v3054_v13  ;;  %2786 = vmatprep.subr.bf16.mxu0 %v3465_v10 }
  0xbc   : > { %2767 = vmatmul.mubr.msk.bf16.gmra.mxu1 %vm602_vm1, %v3055_v14  ;;  %2774 = vmatprep.mubr.msk.bf16.mxu0 %vm3467_vm2, %v3465_v10 }
  0xbd   : > { %2782 = vmatprep.mubr.msk.bf16.mxu1 %vm3467_vm2, %v3465_v10 }
  0xc3   : > { %2775 = vmatmul.mubr.msk.bf16.vlgmr.msra.gmra.mxu0 %vm602_vm1, %v831_v21 }
  0xc4   : > { %2783 = vmatmul.mubr.msk.bf16.vlgmr.msra.gmra.mxu1 %vm602_vm1, %v923_v22  ;;  %2787 = vmatpush3.bf16.msra.mxu0 %v3848_v15 }
  0xc5   : > { %2795 = vmatpush3.bf16.msra.mxu1 %v3831_v9  ;;  %2798 = vmatprep.mubr.msk.bf16.mxu1 %vm3467_vm2, %v3465_v10 }
  0xc6   : > { %2796 = vmatprep.subr.bf16.mxu1 %v3465_v10  ;;  %2788 = vmatprep.subr.bf16.mxu0 %v3465_v10 }
  0xc7   : > { %2790 = vmatprep.mubr.msk.bf16.mxu0 %vm3467_vm2, %v3465_v10 }
  0xc8   : > { %2789 = vmatpush3.bf16.msra.mxu0 %v3856_v17 }
  0xc9   : > { %2797 = vmatpush3.bf16.msra.mxu1 %v3850_v16  ;;  %2802 = vmatprep.subr.bf16.mxu0 %v3465_v10 }
  0xca   : > { %2810 = vmatprep.subr.bf16.mxu1 %v3465_v10 }
 0x173   : > { %v2752_v25 = vpop.f32.mrf.mxu0 }
 0x174   : > { %v3884_v26 = vadd.f32 %v2752_v25, %v2591_v23  ;;  %v2764_v27 = vpop.f32.mrf.mxu1 }
 0x175   : > { %v3886_v28 = vadd.f32 %v2764_v27, %v2602_v24  ;;  %v649_v29 = vpop.f32.mrf.mxu0 }
 0x176   : > { %v777_v30 = vpop.f32.mrf.mxu1  ;;  %v650_v58 = vadd.f32 %v2591_v23, %v649_v29 }
 0x177   : > { %v3888_v31 = vadd.f32 %v2602_v24, %v777_v30  ;;  %v2753_v32 = vpop.f32.mrf.mxu0 }
 0x178   : > { %v3890_v33 = vadd.f32 %v2753_v32, %v2591_v23  ;;  %v2765_v34 = vpop.f32.mrf.mxu1 }
 0x179   : > { %v3892_v35 = vadd.f32 %v2765_v34, %v2602_v24  ;;  %v652_v36 = vpop.f32.mrf.mxu0 }
 0x17a   : > { %v3894_v37 = vadd.f32 %v2591_v23, %v652_v36  ;;  %v780_v38 = vpop.f32.mrf.mxu1 }
 0x17b   : > { %v3896_v39 = vadd.f32 %v2602_v24, %v780_v38  ;;  %v2756_v40 = vpop.f32.mrf.mxu0 }
 0x17c   : > { %v3898_v41 = vadd.f32 %v2756_v40, %v2591_v23  ;;  %v2768_v42 = vpop.f32.mrf.mxu1 }
 0x17d   : > { %v3900_v43 = vadd.f32 %v2768_v42, %v2602_v24  ;;  %v665_v44 = vpop.f32.mrf.mxu0 }
 0x17e   : > { %v3902_v45 = vadd.f32 %v2591_v23, %v665_v44  ;;  %v793_v46 = vpop.f32.mrf.mxu1 }
 0x17f   : > { %v3904_v47 = vadd.f32 %v2602_v24, %v793_v46  ;;  %v2757_v48 = vpop.f32.mrf.mxu0 }
 0x180   : > { %v3906_v49 = vadd.f32 %v2757_v48, %v2591_v23  ;;  %v2769_v50 = vpop.f32.mrf.mxu1 }
 0x181   : > { %v668_v51 = vpop.f32.mrf.mxu0  ;;  %v805_v54 = vadd.f32 %v2769_v50, %v2602_v24 }
 0x182   : > { %v3908_v52 = vadd.f32 %v2591_v23, %v668_v51  ;;  %v796_v53 = vpop.f32.mrf.mxu1  ;;  %v989_v23 = vpop.permute.xlu1 %988 }
 0x183   : > { %v3910_v55 = vadd.f32 %v2602_v24, %v796_v53  ;;  %v881_v56 = vpop.f32.mrf.mxu0 }
 0x184   : > { %v973_v57 = vpop.f32.mrf.mxu1  ;;  %v887_v62 = vadd.f32 %v881_v56, %v650_v58 }
 0x185   : > { %v979_v59 = vadd.f32 %v973_v57, %v805_v54  ;;  %v2776_v60 = vpop.f32.mrf.mxu0 }
 0x186   : > { %v2784_v61 = vpop.f32.mrf.mxu1  ;;  %v2616_v7 = vmul.f32 -1.442695, %v887_v62 }
 0x187   : > { %3063 = vtanh.f32 %v979_v59  ;;  %v884_v63 = vpop.f32.mrf.mxu0  ;;  %v2620_v6 = vmul.f32 -1.442695, %v979_v59 }
 0x188   : > { %v976_v0 = vpop.f32.mrf.mxu1  ;;  %3065 = vtanh.f32 %v887_v62 }
 0x189   : > { %v2777_v1 = vpop.f32.mrf.mxu0  ;;  %3067 = vpow2.f32 %v2620_v6 }
 0x18a   : > { %v2785_v2 = vpop.f32.mrf.mxu1  ;;  %3069 = vpow2.f32 %v2616_v7 }
 0x194   : > { %v3064_v3 = vpop.eup %3063 }
 0x195   : > { %993 = vrot.lane.b32.xlu0 %v3064_v3, %s3466_s19  ;;  %v3066_v4 = vpop.eup %3065 }
 0x196   : > { %v3068_v8 = vpop.eup %3067 }
 0x197   : > { %v983_v11 = vadd.f32 1.0, %v3068_v8  ;;  %v3070_v12 = vpop.eup %3069 }
 0x198   : > { %v891_v13 = vadd.f32 1.0, %v3070_v12 }
 0x199   : > { %901 = vrot.lane.b32.xlu0 %v3066_v4, %s3466_s19  ;;  %3071 = vrcp.f32 %v983_v11 }
 0x19a   : > { %3073 = vrcp.f32 %v891_v13 }
 0x19d   : > { %896 = vrot.lane.b32.xlu0 %v825_v5, %s3466_s19 }
 0x1a6   : > { %v3072_v14 = vpop.eup %3071 }
 0x1a7   : > { %v3074_v20 = vpop.eup %3073  ;;  %v991_v24 = vmul.f32 %v3072_v14, %v989_v23 }
 0x207   : > { %v994_v18 = vpop.permute.xlu0 %993 }
 0x208   : > { %v996_v19 = vmul.f32 %v3072_v14, %v994_v18 }
 0x20a   : > { %998 = vrot.lane.b32.xlu1 %v996_v19, %s3466_s19 }
 0x20b   : > { %v902_v21 = vpop.permute.xlu0 %901 }
 0x20c   : > { %v904_v22 = vmul.f32 %v3074_v20, %v902_v21 }
 0x20e   : > { %906 = vrot.lane.b32.xlu1 %v904_v22, %s3466_s19 }
 0x20f   : > { %v897_v25 = vpop.permute.xlu0 %896 }
 0x210   : > { %v899_v30 = vmul.f32 %v3074_v20, %v897_v25 }
 0x27c   : > { %v999_v27 = vpop.permute.xlu1 %998 }
 0x27d   : > { %v3917_v29 = vadd.f32 %v999_v27, %v991_v24 }
 0x27f   : > { %3075 = vtanh.f32 %v3917_v29 }
 0x280   : > { %v907_v32 = vpop.permute.xlu1 %906 }
 0x281   : > { %v3920_v34 = vadd.f32 %v907_v32, %v899_v30 }
 0x283   : > { %3077 = vtanh.f32 %v3920_v34 }
 0x28c   : > { %v3076_v36 = vpop.eup %3075 }
 0x28d   : > { %1004 = vrot.lane.b32.xlu0 %v3076_v36, %s3466_s19 }
 0x290   : > { %v3078_v38 = vpop.eup %3077 }
 0x291   : > { %912 = vrot.lane.b32.xlu1 %v3078_v38, %s3466_s19 }
 0x2ff   : > { %v1005_v40 = vpop.permute.xlu0 %1004 }
 0x300   : > { %v3925_v42 = vmul.f32 %v3072_v14, %v1005_v40 }
 0x302   : > { %v1096_v44 = vpack.c.bf16 %v3925_v42, %v3925_v42 }
 0x303   : > { %v913_v46 = vpop.permute.xlu1 %912 }
 0x304   : > { %v3929_v48 = vmul.f32 %v3074_v20, %v913_v46  ;;  %1098 = vrot.lane.b32.xlu0 %v1096_v44, %s3468_s4 }
 0x306   : > { %v1016_v50 = vpack.c.bf16 %v3929_v48, %v3929_v48 }
 0x308   : > { %1018 = vrot.lane.b32.xlu1 %v1016_v50, %s3468_s4 }
 0x376   : > { %v1099_v51 = vpop.permute.xlu0 %1098 }
 0x377   : > { %2799 = vmatmul.mubr.msk.bf16.vlgmr.msra.gmra.mxu1 %vm602_vm1, %v1099_v51 }
 0x378   : > { %2811 = vmatpush3.bf16.msra.mxu1 %v3831_v9  ;;  %2814 = vmatprep.mubr.msk.bf16.mxu1 %vm3467_vm2, %v3465_v10 }
 0x379   : > { %2812 = vmatprep.subr.bf16.mxu1 %v3465_v10 }
 0x37a   : > { %v1019_v53 = vpop.permute.xlu1 %1018 }
 0x37b   : > { %2791 = vmatmul.mubr.msk.bf16.vlgmr.msra.gmra.mxu0 %vm602_vm1, %v1019_v53 }
 0x37c   : > { %2803 = vmatpush3.bf16.msra.mxu0 %v3848_v15  ;;  %2813 = vmatpush3.bf16.msra.mxu1 %v3850_v16 }
 0x37d   : > { %2804 = vmatprep.subr.bf16.mxu0 %v3465_v10  ;;  %2806 = vmatprep.mubr.msk.bf16.mxu0 %vm3467_vm2, %v3465_v10 }
 0x37e   : > { %2826 = vmatprep.subr.bf16.mxu1 %v3465_v10 }
 0x380   : > { %2805 = vmatpush3.bf16.msra.mxu0 %v3856_v17 }
 0x381   : > { %2818 = vmatprep.subr.bf16.mxu0 %v3465_v10 }
 0x437   : > { %v1137_v54 = vpop.f32.mrf.mxu1 }
 0x438   : > { %v1143_v56 = vadd.f32 %v1137_v54, %v3900_v43 }
 0x439   : > { %v2800_v57 = vpop.f32.mrf.mxu1 }
 0x43a   : > { %3079 = vtanh.f32 %v1143_v56  ;;  %v2624_v3 = vmul.f32 -1.442695, %v1143_v56 }
 0x43b   : > { %v1057_v58 = vpop.f32.mrf.mxu0  ;;  %v1140_v59 = vpop.f32.mrf.mxu1 }
 0x43c   : > { %v1063_v60 = vadd.f32 %v1057_v58, %v3894_v37 }
 0x43d   : > { %v2792_v61 = vpop.f32.mrf.mxu0  ;;  %v2801_v62 = vpop.f32.mrf.mxu1 }
 0x43e   : > { %3081 = vtanh.f32 %v1063_v60  ;;  %v2622_v43 = vmul.f32 -1.442695, %v1063_v60 }
 0x43f   : > { %v1060_v63 = vpop.f32.mrf.mxu0  ;;  %3083 = vpow2.f32 %v2624_v3 }
 0x440   : > { %3085 = vpow2.f32 %v2622_v43 }
 0x441   : > { %v2793_v0 = vpop.f32.mrf.mxu0 }
 0x447   : > { %v3080_v1 = vpop.eup %3079 }
 0x448   : > { %1153 = vrot.lane.b32.xlu0 %v3080_v1, %s3466_s19 }
 0x44b   : > { %v3082_v2 = vpop.eup %3081 }
 0x44c   : > { %1073 = vrot.lane.b32.xlu1 %v3082_v2, %s3466_s19  ;;  %v3084_v4 = vpop.eup %3083 }
 0x44d   : > { %v1147_v5 = vadd.f32 1.0, %v3084_v4  ;;  %v3086_v6 = vpop.eup %3085 }
 0x44e   : > { %v1067_v37 = vadd.f32 1.0, %v3086_v6 }
 0x44f   : > { %3087 = vrcp.f32 %v1147_v5 }
 0x450   : > { %3089 = vrcp.f32 %v1067_v37 }
 0x45c   : > { %v3088_v7 = vpop.eup %3087 }
 0x45d   : > { %v3090_v12 = vpop.eup %3089  ;;  %v1151_v18 = vmul.f32 %v3088_v7, %v3917_v29 }
 0x45e   : > { %v1071_v21 = vmul.f32 %v3090_v12, %v3920_v34 }
 0x4ba   : > { %v1154_v8 = vpop.permute.xlu0 %1153 }
 0x4bb   : > { %v1156_v11 = vmul.f32 %v3088_v7, %v1154_v8 }
 0x4bd   : > { %1158 = vrot.lane.b32.xlu0 %v1156_v11, %s3466_s19 }
 0x4be   : > { %v1074_v13 = vpop.permute.xlu1 %1073 }
 0x4bf   : > { %v1076_v14 = vmul.f32 %v3090_v12, %v1074_v13 }
 0x4c1   : > { %1078 = vrot.lane.b32.xlu1 %v1076_v14, %s3466_s19 }
 0x52f   : > { %v1159_v19 = vpop.permute.xlu0 %1158 }
 0x530   : > { %v3956_v20 = vadd.f32 %v1159_v19, %v1151_v18 }
 0x532   : > { %3091 = vtanh.f32 %v3956_v20 }
 0x533   : > { %v1079_v22 = vpop.permute.xlu1 %1078 }
 0x534   : > { %v3960_v23 = vadd.f32 %v1079_v22, %v1071_v21 }
 0x536   : > { %3093 = vtanh.f32 %v3960_v23 }
 0x53f   : > { %v3092_v24 = vpop.eup %3091 }
 0x540   : > { %1164 = vrot.lane.b32.xlu0 %v3092_v24, %s3466_s19 }
 0x543   : > { %v3094_v25 = vpop.eup %3093 }
 0x544   : > { %1084 = vrot.lane.b32.xlu1 %v3094_v25, %s3466_s19 }
 0x5b2   : > { %v1165_v27 = vpop.permute.xlu0 %1164 }
 0x5b3   : > { %v3965_v29 = vmul.f32 %v3088_v7, %v1165_v27 }
 0x5b5   : > { %v1256_v30 = vpack.c.bf16 %v3965_v29, %v3965_v29 }
 0x5b6   : > { %v1085_v32 = vpop.permute.xlu1 %1084 }
 0x5b7   : > { %v3969_v36 = vmul.f32 %v3090_v12, %v1085_v32  ;;  %1258 = vrot.lane.b32.xlu0 %v1256_v30, %s3468_s4 }
 0x5b9   : > { %v1176_v34 = vpack.c.bf16 %v3969_v36, %v3969_v36 }
 0x5bb   : > { %1178 = vrot.lane.b32.xlu1 %v1176_v34, %s3468_s4 }
 0x629   : > { %v1259_v38 = vpop.permute.xlu0 %1258 }
 0x62a   : > { %2815 = vmatmul.mubr.msk.bf16.vlgmr.msra.gmra.mxu1 %vm602_vm1, %v1259_v38 }
 0x62b   : > { %2827 = vmatpush3.bf16.msra.mxu1 %v3831_v9  ;;  %2830 = vmatprep.mubr.msk.bf16.mxu1 %vm3467_vm2, %v3465_v10 }
 0x62c   : > { %2828 = vmatprep.subr.bf16.mxu1 %v3465_v10 }
 0x62d   : > { %v1179_v40 = vpop.permute.xlu1 %1178 }
 0x62e   : > { %2807 = vmatmul.mubr.msk.bf16.vlgmr.msra.gmra.mxu0 %vm602_vm1, %v1179_v40 }
 0x62f   : > { %2819 = vmatpush3.bf16.msra.mxu0 %v3848_v15  ;;  %2829 = vmatpush3.bf16.msra.mxu1 %v3850_v16 }
 0x630   : > { %2820 = vmatprep.subr.bf16.mxu0 %v3465_v10  ;;  %2822 = vmatprep.mubr.msk.bf16.mxu0 %vm3467_vm2, %v3465_v10 }
 0x631   : > { %2842 = vmatprep.subr.bf16.mxu1 %v3465_v10 }
 0x633   : > { %2821 = vmatpush3.bf16.msra.mxu0 %v3856_v17 }
 0x634   : > { %2834 = vmatprep.subr.bf16.mxu0 %v3465_v10 }
 0x6ea   : > { %v1297_v44 = vpop.f32.mrf.mxu1 }
 0x6eb   : > { %v1303_v46 = vadd.f32 %v1297_v44, %v3910_v55 }
 0x6ec   : > { %v2816_v50 = vpop.f32.mrf.mxu1 }
 0x6ed   : > { %3095 = vtanh.f32 %v1303_v46  ;;  %v2628_v62 = vmul.f32 -1.442695, %v1303_v46 }
 0x6ee   : > { %v1217_v51 = vpop.f32.mrf.mxu0  ;;  %v1300_v53 = vpop.f32.mrf.mxu1 }
 0x6ef   : > { %v1223_v54 = vadd.f32 %v1217_v51, %v3884_v26 }
 0x6f0   : > { %v2808_v56 = vpop.f32.mrf.mxu0  ;;  %v2817_v57 = vpop.f32.mrf.mxu1 }
 0x6f1   : > { %3097 = vtanh.f32 %v1223_v54  ;;  %v2626_v55 = vmul.f32 -1.442695, %v1223_v54 }
 0x6f2   : > { %v1220_v58 = vpop.f32.mrf.mxu0  ;;  %3099 = vpow2.f32 %v2628_v62 }
 0x6f3   : > { %3101 = vpow2.f32 %v2626_v55 }
 0x6f4   : > { %v2809_v59 = vpop.f32.mrf.mxu0 }
 0x6fa   : > { %v3096_v60 = vpop.eup %3095 }
 0x6fb   : > { %1313 = vrot.lane.b32.xlu0 %v3096_v60, %s3466_s19 }
 0x6fe   : > { %v3098_v61 = vpop.eup %3097 }
 0x6ff   : > { %1233 = vrot.lane.b32.xlu1 %v3098_v61, %s3466_s19  ;;  %v3100_v63 = vpop.eup %3099 }
 0x700   : > { %v1307_v0 = vadd.f32 1.0, %v3100_v63  ;;  %v3102_v1 = vpop.eup %3101 }
 0x701   : > { %v1227_v26 = vadd.f32 1.0, %v3102_v1 }
 0x702   : > { %3103 = vrcp.f32 %v1307_v0 }
 0x703   : > { %3105 = vrcp.f32 %v1227_v26 }
 0x70f   : > { %v3104_v2 = vpop.eup %3103 }
 0x710   : > { %v3106_v4 = vpop.eup %3105  ;;  %v1311_v37 = vmul.f32 %v3104_v2, %v3956_v20 }
 0x711   : > { %v1231_v11 = vmul.f32 %v3106_v4, %v3960_v23 }
 0x76d   : > { %v1314_v3 = vpop.permute.xlu0 %1313 }
 0x76e   : > { %v1316_v43 = vmul.f32 %v3104_v2, %v1314_v3 }
 0x770   : > { %1318 = vrot.lane.b32.xlu0 %v1316_v43, %s3466_s19 }
 0x771   : > { %v1234_v5 = vpop.permute.xlu1 %1233 }
 0x772   : > { %v1236_v6 = vmul.f32 %v3106_v4, %v1234_v5 }
 0x774   : > { %1238 = vrot.lane.b32.xlu1 %v1236_v6, %s3466_s19 }
 0x7e2   : > { %v1319_v7 = vpop.permute.xlu0 %1318 }
 0x7e3   : > { %v3996_v8 = vadd.f32 %v1319_v7, %v1311_v37 }
 0x7e5   : > { %3107 = vtanh.f32 %v3996_v8 }
 0x7e6   : > { %v1239_v12 = vpop.permute.xlu1 %1238 }
 0x7e7   : > { %v4000_v13 = vadd.f32 %v1239_v12, %v1231_v11 }
 0x7e9   : > { %3109 = vtanh.f32 %v4000_v13 }
 0x7f2   : > { %v3108_v14 = vpop.eup %3107 }
 0x7f3   : > { %1324 = vrot.lane.b32.xlu0 %v3108_v14, %s3466_s19 }
 0x7f6   : > { %v3110_v18 = vpop.eup %3109 }
 0x7f7   : > { %1244 = vrot.lane.b32.xlu1 %v3110_v18, %s3466_s19 }
 0x865   : > { %v1325_v19 = vpop.permute.xlu0 %1324 }
 0x866   : > { %v4005_v20 = vmul.f32 %v3104_v2, %v1325_v19 }
 0x868   : > { %v1416_v21 = vpack.c.bf16 %v4005_v20, %v4005_v20 }
 0x869   : > { %v1245_v22 = vpop.permute.xlu1 %1244 }
 0x86a   : > { %v4009_v24 = vmul.f32 %v3106_v4, %v1245_v22  ;;  %1418 = vrot.lane.b32.xlu0 %v1416_v21, %s3468_s4 }
 0x86c   : > { %v1336_v23 = vpack.c.bf16 %v4009_v24, %v4009_v24 }
 0x86e   : > { %1338 = vrot.lane.b32.xlu1 %v1336_v23, %s3468_s4 }
 0x8dc   : > { %v1419_v25 = vpop.permute.xlu0 %1418 }
 0x8dd   : > { %2831 = vmatmul.mubr.msk.bf16.vlgmr.msra.gmra.mxu1 %vm602_vm1, %v1419_v25 }
 0x8de   : > { %2843 = vmatpush3.bf16.msra.mxu1 %v3831_v9  ;;  %2846 = vmatprep.mubr.msk.bf16.mxu1 %vm3467_vm2, %v3465_v10 }
 0x8df   : > { %2844 = vmatprep.subr.bf16.mxu1 %v3465_v10 }
 0x8e0   : > { %v1339_v27 = vpop.permute.xlu1 %1338 }
 0x8e1   : > { %2823 = vmatmul.mubr.msk.bf16.vlgmr.msra.gmra.mxu0 %vm602_vm1, %v1339_v27 }
 0x8e2   : > { %2835 = vmatpush3.bf16.msra.mxu0 %v3848_v15  ;;  %2845 = vmatpush3.bf16.msra.mxu1 %v3850_v16 }
 0x8e3   : > { %2836 = vmatprep.subr.bf16.mxu0 %v3465_v10  ;;  %2838 = vmatprep.mubr.msk.bf16.mxu0 %vm3467_vm2, %v3465_v10 }
 0x8e4   : > { %2858 = vmatprep.subr.bf16.mxu1 %v3465_v10 }
 0x8e6   : > { %2837 = vmatpush3.bf16.msra.mxu0 %v3856_v17 }
 0x8e7   : > { %2850 = vmatprep.subr.bf16.mxu0 %v3465_v10 }
 0x99d   : > { %v1457_v30 = vpop.f32.mrf.mxu1 }
 0x99e   : > { %v1463_v32 = vadd.f32 %v1457_v30, %v3904_v47 }
 0x99f   : > { %v2832_v34 = vpop.f32.mrf.mxu1 }
 0x9a0   : > { %3111 = vtanh.f32 %v1463_v32  ;;  %v2632_v57 = vmul.f32 -1.442695, %v1463_v32 }
 0x9a1   : > { %v1377_v38 = vpop.f32.mrf.mxu0  ;;  %v1460_v40 = vpop.f32.mrf.mxu1 }
 0x9a2   : > { %v1383_v44 = vadd.f32 %v1377_v38, %v3890_v33 }
 0x9a3   : > { %v2824_v46 = vpop.f32.mrf.mxu0  ;;  %v2833_v50 = vpop.f32.mrf.mxu1 }
 0x9a4   : > { %3113 = vtanh.f32 %v1383_v44  ;;  %v2630_v47 = vmul.f32 -1.442695, %v1383_v44 }
 0x9a5   : > { %v1380_v51 = vpop.f32.mrf.mxu0  ;;  %3115 = vpow2.f32 %v2632_v57 }
 0x9a6   : > { %3117 = vpow2.f32 %v2630_v47 }
 0x9a7   : > { %v2825_v53 = vpop.f32.mrf.mxu0 }
 0x9ad   : > { %v3112_v54 = vpop.eup %3111 }
 0x9ae   : > { %1473 = vrot.lane.b32.xlu0 %v3112_v54, %s3466_s19 }
 0x9b1   : > { %v3114_v56 = vpop.eup %3113 }
 0x9b2   : > { %1393 = vrot.lane.b32.xlu1 %v3114_v56, %s3466_s19  ;;  %v3116_v58 = vpop.eup %3115 }
 0x9b3   : > { %v1467_v59 = vadd.f32 1.0, %v3116_v58  ;;  %v3118_v60 = vpop.eup %3117 }
 0x9b4   : > { %v1387_v33 = vadd.f32 1.0, %v3118_v60 }
 0x9b5   : > { %3119 = vrcp.f32 %v1467_v59 }
 0x9b6   : > { %3121 = vrcp.f32 %v1387_v33 }
 0x9c2   : > { %v3120_v61 = vpop.eup %3119 }
 0x9c3   : > { %v3122_v63 = vpop.eup %3121  ;;  %v1471_v26 = vmul.f32 %v3120_v61, %v3996_v8 }
 0x9c4   : > { %v1391_v43 = vmul.f32 %v3122_v63, %v4000_v13 }
 0xa20   : > { %v1474_v62 = vpop.permute.xlu0 %1473 }
 0xa21   : > { %v1476_v55 = vmul.f32 %v3120_v61, %v1474_v62 }
 0xa23   : > { %1478 = vrot.lane.b32.xlu0 %v1476_v55, %s3466_s19 }
 0xa24   : > { %v1394_v0 = vpop.permute.xlu1 %1393 }
 0xa25   : > { %v1396_v1 = vmul.f32 %v3122_v63, %v1394_v0 }
 0xa27   : > { %1398 = vrot.lane.b32.xlu1 %v1396_v1, %s3466_s19 }
 0xa95   : > { %v1479_v2 = vpop.permute.xlu0 %1478 }
 0xa96   : > { %v4036_v3 = vadd.f32 %v1479_v2, %v1471_v26 }
 0xa98   : > { %3123 = vtanh.f32 %v4036_v3 }
 0xa99   : > { %v1399_v4 = vpop.permute.xlu1 %1398 }
 0xa9a   : > { %v4040_v5 = vadd.f32 %v1399_v4, %v1391_v43 }
 0xa9c   : > { %3125 = vtanh.f32 %v4040_v5 }
 0xaa5   : > { %v3124_v6 = vpop.eup %3123 }
 0xaa6   : > { %1484 = vrot.lane.b32.xlu0 %v3124_v6, %s3466_s19 }
 0xaa9   : > { %v3126_v37 = vpop.eup %3125 }
 0xaaa   : > { %1404 = vrot.lane.b32.xlu1 %v3126_v37, %s3466_s19 }
 0xb18   : > { %v1485_v7 = vpop.permute.xlu0 %1484 }
 0xb19   : > { %v4045_v8 = vmul.f32 %v3120_v61, %v1485_v7 }
 0xb1b   : > { %v1576_v11 = vpack.c.bf16 %v4045_v8, %v4045_v8 }
 0xb1c   : > { %v1405_v12 = vpop.permute.xlu1 %1404 }
 0xb1d   : > { %v4049_v14 = vmul.f32 %v3122_v63, %v1405_v12  ;;  %1578 = vrot.lane.b32.xlu0 %v1576_v11, %s3468_s4 }
 0xb1f   : > { %v1496_v13 = vpack.c.bf16 %v4049_v14, %v4049_v14 }
 0xb21   : > { %1498 = vrot.lane.b32.xlu1 %v1496_v13, %s3468_s4 }
 0xb8f   : > { %v1579_v18 = vpop.permute.xlu0 %1578 }
 0xb90   : > { %2847 = vmatmul.mubr.msk.bf16.vlgmr.msra.gmra.mxu1 %vm602_vm1, %v1579_v18 }
 0xb91   : > { %2859 = vmatpush3.bf16.msra.mxu1 %v3831_v9  ;;  %2862 = vmatprep.mubr.msk.bf16.mxu1 %vm3467_vm2, %v3465_v10 }
 0xb92   : > { %2860 = vmatprep.subr.bf16.mxu1 %v3465_v10 }
 0xb93   : > { %v1499_v19 = vpop.permute.xlu1 %1498 }
 0xb94   : > { %2839 = vmatmul.mubr.msk.bf16.vlgmr.msra.gmra.mxu0 %vm602_vm1, %v1499_v19 }
 0xb95   : > { %2851 = vmatpush3.bf16.msra.mxu0 %v3848_v15  ;;  %2861 = vmatpush3.bf16.msra.mxu1 %v3850_v16 }
 0xb96   : > { %2852 = vmatprep.subr.bf16.mxu0 %v3465_v10  ;;  %2854 = vmatprep.mubr.msk.bf16.mxu0 %vm3467_vm2, %v3465_v10 }
 0xb97   : > { %2874 = vmatprep.subr.bf16.mxu1 %v3465_v10 }
 0xb99   : > { %2853 = vmatpush3.bf16.msra.mxu0 %v3856_v17 }
 0xb9a   : > { %2866 = vmatprep.subr.bf16.mxu0 %v3465_v10 }
 0xc50   : > { %v1617_v21 = vpop.f32.mrf.mxu1 }
 0xc51   : > { %v1623_v22 = vadd.f32 %v1617_v21, %v3892_v35 }
 0xc52   : > { %v2848_v23 = vpop.f32.mrf.mxu1 }
 0xc53   : > { %3127 = vtanh.f32 %v1623_v22  ;;  %v2636_v50 = vmul.f32 -1.442695, %v1623_v22 }
 0xc54   : > { %v1537_v25 = vpop.f32.mrf.mxu0  ;;  %v1620_v27 = vpop.f32.mrf.mxu1 }
 0xc55   : > { %v1543_v30 = vadd.f32 %v1537_v25, %v3902_v45 }
 0xc56   : > { %v2840_v32 = vpop.f32.mrf.mxu0  ;;  %v2849_v34 = vpop.f32.mrf.mxu1 }
 0xc57   : > { %3129 = vtanh.f32 %v1543_v30  ;;  %v2634_v35 = vmul.f32 -1.442695, %v1543_v30 }
 0xc58   : > { %v1540_v38 = vpop.f32.mrf.mxu0  ;;  %3131 = vpow2.f32 %v2636_v50 }
 0xc59   : > { %3133 = vpow2.f32 %v2634_v35 }
 0xc5a   : > { %v2841_v40 = vpop.f32.mrf.mxu0 }
 0xc60   : > { %v3128_v44 = vpop.eup %3127 }
 0xc61   : > { %1633 = vrot.lane.b32.xlu0 %v3128_v44, %s3466_s19 }
 0xc64   : > { %v3130_v46 = vpop.eup %3129 }
 0xc65   : > { %1553 = vrot.lane.b32.xlu1 %v3130_v46, %s3466_s19  ;;  %v3132_v51 = vpop.eup %3131 }
 0xc66   : > { %v1627_v53 = vadd.f32 1.0, %v3132_v51  ;;  %v3134_v54 = vpop.eup %3133 }
 0xc67   : > { %v1547_v45 = vadd.f32 1.0, %v3134_v54 }
 0xc68   : > { %3135 = vrcp.f32 %v1627_v53 }
 0xc69   : > { %3137 = vrcp.f32 %v1547_v45 }
 0xc75   : > { %v3136_v56 = vpop.eup %3135 }
 0xc76   : > { %v3138_v58 = vpop.eup %3137  ;;  %v1631_v33 = vmul.f32 %v3136_v56, %v4036_v3 }
 0xc77   : > { %v1551_v55 = vmul.f32 %v3138_v58, %v4040_v5 }
 0xcd3   : > { %v1634_v57 = vpop.permute.xlu0 %1633 }
 0xcd4   : > { %v1636_v47 = vmul.f32 %v3136_v56, %v1634_v57 }
 0xcd6   : > { %1638 = vrot.lane.b32.xlu0 %v1636_v47, %s3466_s19 }
 0xcd7   : > { %v1554_v59 = vpop.permute.xlu1 %1553 }
 0xcd8   : > { %v1556_v60 = vmul.f32 %v3138_v58, %v1554_v59 }
 0xcda   : > { %1558 = vrot.lane.b32.xlu1 %v1556_v60, %s3466_s19 }
 0xd48   : > { %v1639_v61 = vpop.permute.xlu0 %1638 }
 0xd49   : > { %v4076_v62 = vadd.f32 %v1639_v61, %v1631_v33 }
 0xd4b   : > { %3139 = vtanh.f32 %v4076_v62 }
 0xd4c   : > { %v1559_v63 = vpop.permute.xlu1 %1558 }
 0xd4d   : > { %v4080_v0 = vadd.f32 %v1559_v63, %v1551_v55 }
 0xd4f   : > { %3141 = vtanh.f32 %v4080_v0 }
 0xd58   : > { %v3140_v1 = vpop.eup %3139 }
 0xd59   : > { %1644 = vrot.lane.b32.xlu0 %v3140_v1, %s3466_s19 }
 0xd5c   : > { %v3142_v26 = vpop.eup %3141 }
 0xd5d   : > { %1564 = vrot.lane.b32.xlu1 %v3142_v26, %s3466_s19 }
 0xdcb   : > { %v1645_v2 = vpop.permute.xlu0 %1644 }
 0xdcc   : > { %v4085_v3 = vmul.f32 %v3136_v56, %v1645_v2 }
 0xdce   : > { %v1736_v43 = vpack.c.bf16 %v4085_v3, %v4085_v3 }
 0xdcf   : > { %v1565_v4 = vpop.permute.xlu1 %1564 }
 0xdd0   : > { %v4089_v6 = vmul.f32 %v3138_v58, %v1565_v4  ;;  %1738 = vrot.lane.b32.xlu0 %v1736_v43, %s3468_s4 }
 0xdd2   : > { %v1656_v5 = vpack.c.bf16 %v4089_v6, %v4089_v6 }
 0xdd4   : > { %1658 = vrot.lane.b32.xlu1 %v1656_v5, %s3468_s4 }
 0xe42   : > { %v1739_v37 = vpop.permute.xlu0 %1738 }
 0xe43   : > { %2863 = vmatmul.mubr.msk.bf16.vlgmr.msra.gmra.mxu1 %vm602_vm1, %v1739_v37 }
 0xe44   : > { %2875 = vmatpush3.bf16.msra.mxu1 %v3831_v9  ;;  %2878 = vmatprep.mubr.msk.bf16.mxu1 %vm3467_vm2, %v3465_v10 }
 0xe45   : > { %2876 = vmatprep.subr.bf16.mxu1 %v3465_v10 }
 0xe46   : > { %v1659_v7 = vpop.permute.xlu1 %1658 }
 0xe47   : > { %2855 = vmatmul.mubr.msk.bf16.vlgmr.msra.gmra.mxu0 %vm602_vm1, %v1659_v7 }
 0xe48   : > { %2867 = vmatpush3.bf16.msra.mxu0 %v3848_v15  ;;  %2877 = vmatpush3.bf16.msra.mxu1 %v3850_v16 }
 0xe49   : > { %2868 = vmatprep.subr.bf16.mxu0 %v3465_v10  ;;  %2870 = vmatprep.mubr.msk.bf16.mxu0 %vm3467_vm2, %v3465_v10 }
 0xe4a   : > { %2890 = vmatprep.subr.bf16.mxu1 %v3465_v10 }
 0xe4c   : > { %2869 = vmatpush3.bf16.msra.mxu0 %v3856_v17 }
 0xe4d   : > { %2882 = vmatprep.subr.bf16.mxu0 %v3465_v10 }
 0xf03   : > { %v1777_v11 = vpop.f32.mrf.mxu1 }
 0xf04   : > { %v1783_v12 = vadd.f32 %v1777_v11, %v3886_v28 }
 0xf05   : > { %v2864_v13 = vpop.f32.mrf.mxu1 }
 0xf06   : > { %3143 = vtanh.f32 %v1783_v12  ;;  %v2640_v34 = vmul.f32 -1.442695, %v1783_v12 }
 0xf07   : > { %v1697_v18 = vpop.f32.mrf.mxu0  ;;  %v1780_v19 = vpop.f32.mrf.mxu1 }
 0xf08   : > { %v1703_v21 = vadd.f32 %v1697_v18, %v3908_v52 }
 0xf09   : > { %v2856_v22 = vpop.f32.mrf.mxu0  ;;  %v2865_v23 = vpop.f32.mrf.mxu1 }
 0xf0a   : > { %3145 = vtanh.f32 %v1703_v21  ;;  %v2638_v28 = vmul.f32 -1.442695, %v1703_v21 }
 0xf0b   : > { %v1700_v25 = vpop.f32.mrf.mxu0  ;;  %3147 = vpow2.f32 %v2640_v34 }
 0xf0c   : > { %3149 = vpow2.f32 %v2638_v28 }
 0xf0d   : > { %v2857_v27 = vpop.f32.mrf.mxu0 }
 0xf13   : > { %v3144_v30 = vpop.eup %3143 }
 0xf14   : > { %1793 = vrot.lane.b32.xlu0 %v3144_v30, %s3466_s19 }
 0xf17   : > { %v3146_v32 = vpop.eup %3145 }
 0xf18   : > { %1713 = vrot.lane.b32.xlu1 %v3146_v32, %s3466_s19  ;;  %v3148_v38 = vpop.eup %3147 }
 0xf19   : > { %v1787_v40 = vadd.f32 1.0, %v3148_v38  ;;  %v3150_v44 = vpop.eup %3149 }
 0xf1a   : > { %v1707_v52 = vadd.f32 1.0, %v3150_v44 }
 0xf1b   : > { %3151 = vrcp.f32 %v1787_v40 }
 0xf1c   : > { %3153 = vrcp.f32 %v1707_v52 }
 0xf28   : > { %v3152_v46 = vpop.eup %3151 }
 0xf29   : > { %v3154_v51 = vpop.eup %3153  ;;  %v1791_v45 = vmul.f32 %v3152_v46, %v4076_v62 }
 0xf2a   : > { %v1711_v47 = vmul.f32 %v3154_v51, %v4080_v0 }
 0xf86   : > { %v1794_v50 = vpop.permute.xlu0 %1793 }
 0xf87   : > { %v1796_v35 = vmul.f32 %v3152_v46, %v1794_v50 }
 0xf89   : > { %1798 = vrot.lane.b32.xlu0 %v1796_v35, %s3466_s19 }
 0xf8a   : > { %v1714_v53 = vpop.permute.xlu1 %1713 }
 0xf8b   : > { %v1716_v54 = vmul.f32 %v3154_v51, %v1714_v53 }
 0xf8d   : > { %1718 = vrot.lane.b32.xlu1 %v1716_v54, %s3466_s19 }
 0xffb   : > { %v1799_v56 = vpop.permute.xlu0 %1798 }
 0xffc   : > { %v4116_v57 = vadd.f32 %v1799_v56, %v1791_v45 }
 0xffe   : > { %3155 = vtanh.f32 %v4116_v57 }
 0xfff   : > { %v1719_v58 = vpop.permute.xlu1 %1718 }
0x1000   : > { %v4120_v59 = vadd.f32 %v1719_v58, %v1711_v47 }
0x1002   : > { %3157 = vtanh.f32 %v4120_v59 }
0x100b   : > { %v3156_v60 = vpop.eup %3155 }
0x100c   : > { %1804 = vrot.lane.b32.xlu0 %v3156_v60, %s3466_s19 }
0x100f   : > { %v3158_v33 = vpop.eup %3157 }
0x1010   : > { %1724 = vrot.lane.b32.xlu1 %v3158_v33, %s3466_s19 }
0x107e   : > { %v1805_v61 = vpop.permute.xlu0 %1804 }
0x107f   : > { %v4125_v62 = vmul.f32 %v3152_v46, %v1805_v61 }
0x1081   : > { %v1896_v55 = vpack.c.bf16 %v4125_v62, %v4125_v62 }
0x1082   : > { %v1725_v63 = vpop.permute.xlu1 %1724 }
0x1083   : > { %v4129_v1 = vmul.f32 %v3154_v51, %v1725_v63  ;;  %1898 = vrot.lane.b32.xlu0 %v1896_v55, %s3468_s4 }
0x1085   : > { %v1816_v0 = vpack.c.bf16 %v4129_v1, %v4129_v1 }
0x1087   : > { %1818 = vrot.lane.b32.xlu1 %v1816_v0, %s3468_s4 }
0x10f5   : > { %v1899_v26 = vpop.permute.xlu0 %1898 }
0x10f6   : > { %2879 = vmatmul.mubr.msk.bf16.vlgmr.msra.gmra.mxu1 %vm602_vm1, %v1899_v26 }
0x10f7   : > { %2891 = vmatpush3.bf16.msra.mxu1 %v3831_v9  ;;  %2894 = vmatprep.mubr.msk.bf16.mxu1 %vm3467_vm2, %v3465_v10 }
0x10f8   : > { %2892 = vmatprep.subr.bf16.mxu1 %v3465_v10 }
0x10f9   : > { %v1819_v2 = vpop.permute.xlu1 %1818 }
0x10fa   : > { %2871 = vmatmul.mubr.msk.bf16.vlgmr.msra.gmra.mxu0 %vm602_vm1, %v1819_v2 }
0x10fb   : > { %2883 = vmatpush3.bf16.msra.mxu0 %v3848_v15  ;;  %2893 = vmatpush3.bf16.msra.mxu1 %v3850_v16 }
0x10fc   : > { %2884 = vmatprep.subr.bf16.mxu0 %v3465_v10  ;;  %2886 = vmatprep.mubr.msk.bf16.mxu0 %vm3467_vm2, %v3465_v10 }
0x10ff   : > { %2885 = vmatpush3.bf16.msra.mxu0 %v3856_v17 }
0x11b6   : > { %v1937_v9 = vpop.f32.mrf.mxu1 }
0x11b7   : > { %v1943_v43 = vadd.f32 %v1937_v9, %v3896_v39 }
0x11b8   : > { %v2880_v4 = vpop.f32.mrf.mxu1 }
0x11b9   : > { %3159 = vtanh.f32 %v1943_v43  ;;  %v2644_v17 = vmul.f32 -1.442695, %v1943_v43 }
0x11ba   : > { %v1857_v5 = vpop.f32.mrf.mxu0  ;;  %v1940_v37 = vpop.f32.mrf.mxu1 }
0x11bb   : > { %v1863_v7 = vadd.f32 %v1857_v5, %v3898_v41 }
0x11bc   : > { %v2872_v11 = vpop.f32.mrf.mxu0  ;;  %v2881_v15 = vpop.f32.mrf.mxu1 }
0x11bd   : > { %3161 = vtanh.f32 %v1863_v7  ;;  %v2642_v39 = vmul.f32 -1.442695, %v1863_v7 }
0x11be   : > { %v1860_v16 = vpop.f32.mrf.mxu0  ;;  %3163 = vpow2.f32 %v2644_v17 }
0x11bf   : > { %3165 = vpow2.f32 %v2642_v39 }
0x11c0   : > { %v2873_v12 = vpop.f32.mrf.mxu0 }
0x11c6   : > { %v3160_v13 = vpop.eup %3159 }
0x11c7   : > { %1953 = vrot.lane.b32.xlu0 %v3160_v13, %s3466_s19 }
0x11ca   : > { %v3162_v10 = vpop.eup %3161 }
0x11cb   : > { %1873 = vrot.lane.b32.xlu1 %v3162_v10, %s3466_s19  ;;  %v3164_v18 = vpop.eup %3163 }
0x11cc   : > { %v1947_v19 = vadd.f32 1.0, %v3164_v18  ;;  %v3166_v21 = vpop.eup %3165 }
0x11cd   : > { %v1867_v41 = vadd.f32 1.0, %v3166_v21 }
0x11ce   : > { %3167 = vrcp.f32 %v1947_v19 }
0x11cf   : > { %3169 = vrcp.f32 %v1867_v41 }
0x11db   : > { %v3168_v22 = vpop.eup %3167 }
0x11dc   : > { %v3170_v27 = vpop.eup %3169  ;;  %v1951_v34 = vmul.f32 %v3168_v22, %v4116_v57 }
0x11dd   : > { %v1871_v40 = vmul.f32 %v3170_v27, %v4120_v59 }
0x1239   : > { %v1954_v23 = vpop.permute.xlu0 %1953 }
0x123a   : > { %v1956_v25 = vmul.f32 %v3168_v22, %v1954_v23  ;;  %v3059_v23 = vld [vmem:[%s4392_s8 + $0x8] sm:$0xff]  }
0x123b   : > { %2898 = vmatprep.subr.bf16.mxu0 %v3059_v23 }
0x123c   : > { %1958 = vrot.lane.b32.xlu0 %v1956_v25, %s3466_s19 }
0x123d   : > { %v1874_v30 = vpop.permute.xlu1 %1873 }
0x123e   : > { %v1876_v32 = vmul.f32 %v3170_v27, %v1874_v30 }
0x1240   : > { %1878 = vrot.lane.b32.xlu1 %v1876_v32, %s3466_s19 }
0x12ae   : > { %v1959_v28 = vpop.permute.xlu0 %1958 }
0x12af   : > { %v1961_v38 = vadd.f32 %v1959_v28, %v1951_v34 }
0x12b1   : > { %3171 = vtanh.f32 %v1961_v38 }
0x12b2   : > { %v1879_v44 = vpop.permute.xlu1 %1878 }
0x12b3   : > { %v1881_v52 = vadd.f32 %v1879_v44, %v1871_v40 }
0x12b5   : > { %3173 = vtanh.f32 %v1881_v52 }
0x12be   : > { %v3172_v46 = vpop.eup %3171 }
0x12bf   : > { %1964 = vrot.lane.b32.xlu0 %v3172_v46, %s3466_s19 }
0x12c2   : > { %v3174_v50 = vpop.eup %3173 }
0x12c3   : > { %1884 = vrot.lane.b32.xlu1 %v3174_v50, %s3466_s19 }
0x1331   : > { %v1965_v35 = vpop.permute.xlu0 %1964 }
0x1332   : > { %v4157_v51 = vmul.f32 %v3168_v22, %v1965_v35 }
0x1334   : > { %v2055_v53 = vpack.c.bf16 %v4157_v51, %v4157_v51 }
0x1335   : > { %v1885_v54 = vpop.permute.xlu1 %1884 }
0x1336   : > { %v4161_v45 = vmul.f32 %v3170_v27, %v1885_v54  ;;  %2057 = vrot.lane.b32.xlu0 %v2055_v53, %s3468_s4  ;;  %v3060_v27 = vld [vmem:[%s4392_s8] sm:$0xff]  }
0x1338   : > { %v1976_v56 = vpack.c.bf16 %v4161_v45, %v4161_v45 }
0x133a   : > { %1978 = vrot.lane.b32.xlu1 %v1976_v56, %s3468_s4 }
0x13a8   : > { %v2058_v57 = vpop.permute.xlu0 %2057 }
0x13a9   : > { %2895 = vmatmul.mubr.msk.bf16.vlgmr.msra.gmra.mxu1 %vm602_vm1, %v2058_v57 }
0x13ac   : > { %v1979_v47 = vpop.permute.xlu1 %1978 }
0x13ad   : > { %2887 = vmatmul.mubr.msk.bf16.vlgmr.msra.gmra.mxu0 %vm602_vm1, %v1979_v47 }
0x13ae   : > { %2899 = vmatpush3.bf16.msra.mxu0 %v3059_v23 }
0x13af   : > { %2900 = vmatprep.subr.bf16.mxu0 %v3060_v27 }
0x13b2   : > { %2901 = vmatpush3.bf16.msra.mxu0 %v3060_v27 }
0x1469   : > { %v2096_v58 = vpop.f32.mrf.mxu1 }
0x146a   : > { %v2102_v59 = vadd.f32 %v2096_v58, %v3888_v31 }
0x146b   : > { %v2896_v60 = vpop.f32.mrf.mxu1 }
0x146c   : > { %3175 = vtanh.f32 %v2102_v59  ;;  %v2648_v4 = vmul.f32 -1.442695, %v2102_v59 }
0x146d   : > { %v2017_v33 = vpop.f32.mrf.mxu0  ;;  %v2099_v61 = vpop.f32.mrf.mxu1 }
0x146e   : > { %v2023_v55 = vadd.f32 %v2017_v33, %v3906_v49 }
0x146f   : > { %v2888_v63 = vpop.f32.mrf.mxu0  ;;  %v2897_v0 = vpop.f32.mrf.mxu1 }
0x1470   : > { %3177 = vtanh.f32 %v2023_v55  ;;  %v2646_v31 = vmul.f32 -1.442695, %v2023_v55 }
0x1471   : > { %v2020_v26 = vpop.f32.mrf.mxu0  ;;  %3179 = vpow2.f32 %v2648_v4 }
0x1472   : > { %3181 = vpow2.f32 %v2646_v31 }
0x1473   : > { %v2889_v2 = vpop.f32.mrf.mxu0 }
0x1479   : > { %v3176_v9 = vpop.eup %3175 }
0x147a   : > { %2112 = vrot.lane.b32.xlu0 %v3176_v9, %s3466_s19 }
0x147d   : > { %v3178_v43 = vpop.eup %3177 }
0x147e   : > { %2033 = vrot.lane.b32.xlu1 %v3178_v43, %s3466_s19  ;;  %v3180_v5 = vpop.eup %3179 }
0x147f   : > { %v2106_v37 = vadd.f32 1.0, %v3180_v5  ;;  %v3182_v7 = vpop.eup %3181 }
0x1480   : > { %v2027_v49 = vadd.f32 1.0, %v3182_v7 }
0x1481   : > { %3183 = vrcp.f32 %v2106_v37 }
0x1482   : > { %3185 = vrcp.f32 %v2027_v49 }
0x148e   : > { %v3184_v11 = vpop.eup %3183 }
0x148f   : > { %v3186_v12 = vpop.eup %3185  ;;  %v2110_v17 = vmul.f32 %v3184_v11, %v1961_v38 }
0x1490   : > { %v2031_v19 = vmul.f32 %v3186_v12, %v1881_v52 }
0x14ec   : > { %v2113_v15 = vpop.permute.xlu0 %2112 }
0x14ed   : > { %v2115_v16 = vmul.f32 %v3184_v11, %v2113_v15 }
0x14ef   : > { %2117 = vrot.lane.b32.xlu0 %v2115_v16, %s3466_s19 }
0x14f0   : > { %v2034_v13 = vpop.permute.xlu1 %2033 }
0x14f1   : > { %v2036_v10 = vmul.f32 %v3186_v12, %v2034_v13 }
0x14f3   : > { %2038 = vrot.lane.b32.xlu1 %v2036_v10, %s3466_s19 }
0x1561   : > { %v2118_v39 = vpop.permute.xlu0 %2117 }
0x1562   : > { %v2120_v18 = vadd.f32 %v2118_v39, %v2110_v17 }
0x1564   : > { %3187 = vtanh.f32 %v2120_v18 }
0x1565   : > { %v2039_v21 = vpop.permute.xlu1 %2038 }
0x1566   : > { %v2041_v41 = vadd.f32 %v2039_v21, %v2031_v19 }
0x1568   : > { %3189 = vtanh.f32 %v2041_v41 }
0x1571   : > { %v3188_v22 = vpop.eup %3187 }
0x1572   : > { %2123 = vrot.lane.b32.xlu0 %v3188_v22, %s3466_s19 }
0x1575   : > { %v3190_v25 = vpop.eup %3189 }
0x1576   : > { %917 = vrot.lane.b32.xlu0 %v3929_v48, %s3468_s4  ;;  %2044 = vrot.lane.b32.xlu1 %v3190_v25, %s3466_s19  ;;  %v3061_v48 = vld [vmem:[%s4393_s9 + $0x8] sm:$0xff]   ;;  %s2397_s19 = sshll.u32 %s3807_s11, 4  ;;  %s4282_s19 = int_to_ptr.vmem [resolvable:$true] %s2397_s19 }
0x1577   : > { %2910 = vmatprep.subr.bf16.mxu1 %v3061_v48  ;;  %p3332_p7 = scmp.lt.s32.totalorder %s4282_s19, %s3330_s29 }
0x1578   : > { %2911 = vmatpush3.bf16.msra.mxu1 %v3061_v48 }
0x157a   : > { %1249 = vrot.lane.b32.xlu0 %v4009_v24, %s3468_s4  ;;  %1089 = vrot.lane.b32.xlu1 %v3969_v36, %s3468_s4  ;;  %v3062_v36 = vld [vmem:[%s4393_s9] sm:$0xff]  }
0x157b   : > { %2912 = vmatprep.subr.bf16.mxu1 %v3062_v36 }
0x157c   : > { %2913 = vmatpush3.bf16.msra.mxu1 %v3062_v36 }
0x157e   : > { %1969 = vrot.lane.b32.xlu0 %v4157_v51, %s3468_s4  ;;  %1409 = vrot.lane.b32.xlu1 %v4049_v14, %s3468_s4 }
0x1582   : > { %1649 = vrot.lane.b32.xlu0 %v4085_v3, %s3468_s4  ;;  %1809 = vrot.lane.b32.xlu1 %v4125_v62, %s3468_s4 }
0x1586   : > { %1569 = vrot.lane.b32.xlu0 %v4089_v6, %s3468_s4  ;;  %1729 = vrot.lane.b32.xlu1 %v4129_v1, %s3468_s4 }
0x158a   : > { %1889 = vrot.lane.b32.xlu0 %v4161_v45, %s3468_s4 }
0x158e   : > { %1329 = vrot.lane.b32.xlu0 %v4005_v20, %s3468_s4 }
0x1592   : > { %1009 = vrot.lane.b32.xlu0 %v3925_v42, %s3468_s4 }
0x1596   : > { %2134 = vrot.lane.b32.xlu0 %v2041_v41, %s3469_s20 }
0x15e4   : > { %v2124_v24 = vpop.permute.xlu0 %2123 }
0x15e5   : > { %v2126_v20 = vmul.f32 %v3184_v11, %v2124_v24  ;;  %v2649_v11 = vld [vmem:[%s4394_s10] ss:$0 sm:$0xff] }
0x15e7   : > { %2128 = vrot.lane.b32.xlu1 %v2126_v20, %s3468_s4 }
0x15e8   : > { %v918_v42 = vpop.permute.xlu0 %917  ;;  %v2045_v14 = vpop.permute.xlu1 %2044 }
0x15e9   : > { %920 = vst.msk [vmem:[#allocation6] sm:$0xff] %vm602_vm1, %v918_v42  ;;  %v2047_v62 = vmul.f32 %v3186_v12, %v2045_v14 }
0x15eb   : > { %1489 = vrot.lane.b32.xlu1 %v4045_v8, %s3468_s4 }
0x15ec   : > { %v1250_v3 = vpop.permute.xlu0 %1249  ;;  %v1090_v6 = vpop.permute.xlu1 %1089 }
0x15ed   : > { %1253 = vst.msk [vmem:[#allocation6 + $0x10] sm:$0xff] %vm602_vm1, %v1250_v3  ;;  %1093 = vst.msk [vmem:[#allocation6 + $0x8] sm:$0xff] %vm602_vm1, %v1090_v6 }
0x15ef   : > { %2049 = vrot.lane.b32.xlu1 %v2047_v62, %s3468_s4 }
0x15f0   : > { %v1970_v1 = vpop.permute.xlu0 %1969  ;;  %v1410_v30 = vpop.permute.xlu1 %1409  ;;  %v2144_v34 = vld [vmem:[#allocation6] sm:$0xff] }
0x15f1   : > { %1973 = vst.msk [vmem:[#allocation7 + $0x8] sm:$0xff] %vm602_vm1, %v1970_v1  ;;  %1413 = vst.msk [vmem:[#allocation6 + $0x18] sm:$0xff] %vm602_vm1, %v1410_v30 }
0x15f3   : > { %1169 = vrot.lane.b32.xlu1 %v3965_v29, %s3468_s4  ;;  %s2407_s4 = ssub.s32 1, %s3575_s28  ;;  %s4466_s28 = sld [smem:[#allocation31_spill]] }
0x15f4   : > { %v1650_v32 = vpop.permute.xlu0 %1649  ;;  %v1810_v8 = vpop.permute.xlu1 %1809  ;;  %v2145_v28 = vld [vmem:[#allocation6 + $0x8] sm:$0xff]  ;;  %v2146_v52 = vld [vmem:[#allocation6 + $0x10] sm:$0xff]  ;;  %s2673_s0 = sshll.u32 %s2407_s4, 10  ;;  %s3325_s4 = scalar_lea.vmem %s4282_s19, 1024 }
0x15f5   : > { %1653 = vst.msk [vmem:[#allocation7 + $0x18] sm:$0xff] %vm602_vm1, %v1650_v32  ;;  %1813 = vst.msk [vmem:[#allocation7 + $0x10] sm:$0xff] %vm602_vm1, %v1810_v8  ;;  %v2152_v38 = vpack.c.bf16 %v2145_v28, %v2144_v34  ;;  %s4296_s30 = scalar_lea.hbm %s4467_s7, %s2673_s0  ;;  %p3326_p1 = scmp.ne.s32.totalorder %s4282_s19, %s3325_s4 }
0x15f7   : > { %2140 = vrot.lane.b32.xlu1 %v2120_v18, %s3469_s20  ;;  %2902 = vmatprep.mubr.msk.bf16.mxu0 %vm602_vm1, %v2152_v38  ;;  %s4280_s20 = scalar_lea.hbm %s4464_s21, %s2672_s17 }
0x15f8   : > { %v1570_v40 = vpop.permute.xlu0 %1569  ;;  %v1730_v44 = vpop.permute.xlu1 %1729  ;;  %v2147_v46 = vld [vmem:[#allocation6 + $0x18] sm:$0xff]  ;;  %v2157_v61 = vld [vmem:[#allocation7 + $0x8] sm:$0xff] }
0x15f9   : > { %1573 = vst.msk [vmem:[#allocation6 + $0x20] sm:$0xff] %vm602_vm1, %v1570_v40  ;;  %1733 = vst.msk [vmem:[#allocation6 + $0x28] sm:$0xff] %vm602_vm1, %v1730_v44  ;;  %v2153_v29 = vpack.c.bf16 %v2147_v46, %v2146_v52  ;;  %p4468_p2 = scmp.ne.s32.totalorder %s4466_s28, 0 }
0x15fb   : > { %2903 = vmatmul.mubr.msk.bf16.vlgmr.msra.gmra.mxu0 %vm602_vm1, %v2153_v29  ;;  %p3327_p8 = pnand %p3326_p1, %p4468_p2 }
0x15fc   : > { %v1890_v50 = vpop.permute.xlu0 %1889  ;;  %v2158_v58 = vld [vmem:[#allocation7 + $0x10] sm:$0xff]  ;;  %v2159_v59 = vld [vmem:[#allocation7 + $0x18] sm:$0xff] }
0x15fd   : > { %1893 = vst.msk [vmem:[#allocation6 + $0x30] sm:$0xff] %vm602_vm1, %v1890_v50  ;;  %v2165_v63 = vpack.c.bf16 %v2159_v59, %v2158_v58  ;;  %p3328_p9 = pneg %p3327_p8 }
0x1600   : > { %v1330_v35 = vpop.permute.xlu0 %1329  ;;  %v2148_v51 = vld [vmem:[#allocation6 + $0x20] sm:$0xff]  ;;  %v2149_v53 = vld [vmem:[#allocation6 + $0x28] sm:$0xff] }
0x1601   : > { %1333 = vst.msk [vmem:[#allocation7 + $0x28] sm:$0xff] %vm602_vm1, %v1330_v35  ;;  %v2154_v54 = vpack.c.bf16 %v2149_v53, %v2148_v51 }
0x1603   : > { %2906 = vmatprep.mubr.msk.bf16.mxu0 %vm602_vm1, %v2154_v54 }
0x1604   : > { %v1010_v45 = vpop.permute.xlu0 %1009  ;;  %v2150_v4 = vld [vmem:[#allocation6 + $0x30] sm:$0xff] }
0x1605   : > { %1013 = vst.msk [vmem:[#allocation7 + $0x38] sm:$0xff] %vm602_vm1, %v1010_v45 }
0x1608   : > { %v2135_v56 = vpop.permute.xlu0 %2134  ;;  %v2161_v2 = vld [vmem:[#allocation7 + $0x28] sm:$0xff] }
0x1609   : > { %2137 = vst.msk [vmem:[#allocation3] sm:$0xff] %vm602_vm1, %v2135_v56 }
0x160c   : > { %v2163_v7 = vld [vmem:[#allocation7 + $0x38] sm:$0xff] }
0x1659   : > { %v2129_v57 = vpop.permute.xlu1 %2128 }
0x165a   : > { %2131 = vst.msk [vmem:[#allocation7] sm:$0xff] %vm602_vm1, %v2129_v57  ;;  %2138 = vst.msk [vmem:[#allocation2 + $0x8] sm:$0xff] %vm602_vm1, %v2129_v57 }
0x165d   : > { %v1490_v47 = vpop.permute.xlu1 %1489 }
0x165e   : > { %1493 = vst.msk [vmem:[#allocation7 + $0x20] sm:$0xff] %vm602_vm1, %v1490_v47 }
0x1661   : > { %v2050_v60 = vpop.permute.xlu1 %2049  ;;  %v2156_v33 = vld [vmem:[#allocation7] sm:$0xff] }
0x1662   : > { %2053 = vst.msk [vmem:[#allocation6 + $0x38] sm:$0xff] %vm602_vm1, %v2050_v60  ;;  %2132 = vst.msk [vmem:[#allocation2] sm:$0xff] %vm602_vm1, %v2050_v60  ;;  %v2164_v55 = vpack.c.bf16 %v2157_v61, %v2156_v33 }
0x1664   : > { %2914 = vmatprep.mubr.msk.bf16.mxu1 %vm602_vm1, %v2164_v55 }
0x1665   : > { %2915 = vmatmul.mubr.msk.bf16.vlgmr.msra.gmra.mxu1 %vm602_vm1, %v2165_v63  ;;  %v1170_v0 = vpop.permute.xlu1 %1169  ;;  %v2160_v26 = vld [vmem:[#allocation7 + $0x20] sm:$0xff] }
0x1666   : > { %1173 = vst.msk [vmem:[#allocation7 + $0x30] sm:$0xff] %vm602_vm1, %v1170_v0  ;;  %v2166_v9 = vpack.c.bf16 %v2161_v2, %v2160_v26 }
0x1668   : > { %2918 = vmatprep.mubr.msk.bf16.mxu1 %vm602_vm1, %v2166_v9 }
0x1669   : > { %v2141_v43 = vpop.permute.xlu1 %2140  ;;  %v2151_v31 = vld [vmem:[#allocation6 + $0x38] sm:$0xff] }
0x166a   : > { %2143 = vst.msk [vmem:[#allocation3 + $0x8] sm:$0xff] %vm602_vm1, %v2141_v43  ;;  %v2155_v5 = vpack.c.bf16 %v2151_v31, %v2150_v4 }
0x166c   : > { %2907 = vmatmul.mubr.msk.bf16.gmra.mxu0 %vm602_vm1, %v2155_v5 }
0x166d   : > { %v2162_v37 = vld [vmem:[#allocation7 + $0x30] sm:$0xff] }
0x166e   : > { %v2167_v49 = vpack.c.bf16 %v2163_v7, %v2162_v37 }
0x1670   : > { %2919 = vmatmul.mubr.msk.bf16.gmra.mxu1 %vm602_vm1, %v2167_v49 }
0x16bb   : > { %v2904_v15 = vpop.f32.mrf.mxu0 }
0x16bc   : > { %v2246_v16 = vadd.f32 %v2904_v15, %v2649_v11 }
0x16bd   : > { %v2237_v12 = vpop.f32.mrf.mxu0 }
0x16be   : > { %2271 = vst.msk [vmem:[%s3807_s11 + $0x10] sm:$0xff] %vm2268_vm3, %v2246_v16  ;;  %v2238_v13 = vadd.f32 %v2649_v11, %v2237_v12 }
0x16bf   : > { %v2905_v10 = vpop.f32.mrf.mxu0 }
0x16c0   : > { %2269 = vst.msk [vmem:[%s3807_s11] sm:$0xff] %vm2268_vm3, %v2238_v13  ;;  %v2249_v17 = vadd.f32 %v2905_v10, %v2649_v11 }
0x16c1   : > { %v2240_v39 = vpop.f32.mrf.mxu0 }
0x16c2   : > { %2272 = vst.msk [vmem:[%s3807_s11 + $0x18] sm:$0xff] %vm2268_vm3, %v2249_v17  ;;  %v2241_v18 = vadd.f32 %v2649_v11, %v2240_v39 }
0x16c4   : > { %2270 = vst.msk [vmem:[%s3807_s11 + $0x8] sm:$0xff] %vm2268_vm3, %v2241_v18 }
0x1725   : > { %v2916_v19 = vpop.f32.mrf.mxu1 }
0x1726   : > { %2372 = vst.msk [vmem:[%s3809_s13 + $0x10] sm:$0xff] %vm2268_vm3, %v2916_v19 }
0x1727   : > { %v2339_v21 = vpop.f32.mrf.mxu1 }
0x1728   : > { %2370 = vst.msk [vmem:[%s3809_s13] sm:$0xff] %vm2268_vm3, %v2339_v21 }
0x1729   : > { %v2917_v41 = vpop.f32.mrf.mxu1 }
0x172a   : > { %2373 = vst.msk [vmem:[%s3809_s13 + $0x18] sm:$0xff] %vm2268_vm3, %v2917_v41 }
0x172b   : > { %v2342_v22 = vpop.f32.mrf.mxu1 }
0x172c   : > { %2371 = vst.msk [vmem:[%s3809_s13 + $0x8] sm:$0xff] %vm2268_vm3, %v2342_v22  ;;  %v2908_v23 = vpop.f32.mrf.mxu0 }
0x172d   : > { %v2262_v25 = vadd.f32 %v2908_v23, %v2649_v11 }
0x172e   : > { %v2253_v27 = vpop.f32.mrf.mxu0 }
0x172f   : > { %2275 = vst.msk [vmem:[%s3807_s11 + $0x30] sm:$0xff] %vm2268_vm3, %v2262_v25  ;;  %v2254_v48 = vadd.f32 %v2649_v11, %v2253_v27 }
0x1730   : > { %v2909_v36 = vpop.f32.mrf.mxu0  ;;  %v2920_v24 = vpop.f32.mrf.mxu1 }
0x1731   : > { %2273 = vst.msk [vmem:[%s3807_s11 + $0x20] sm:$0xff] %vm2268_vm3, %v2254_v48  ;;  %v2265_v20 = vadd.f32 %v2909_v36, %v2649_v11  ;;  %2376 = vst.msk [vmem:[%s3809_s13 + $0x30] sm:$0xff] %vm2268_vm3, %v2920_v24 }
0x1732   : > { %v2256_v42 = vpop.f32.mrf.mxu0  ;;  %v2355_v14 = vpop.f32.mrf.mxu1 }
0x1733   : > { %2276 = vst.msk [vmem:[%s3807_s11 + $0x38] sm:$0xff] %vm2268_vm3, %v2265_v20  ;;  %v2257_v3 = vadd.f32 %v2649_v11, %v2256_v42  ;;  %2374 = vst.msk [vmem:[%s3809_s13 + $0x20] sm:$0xff] %vm2268_vm3, %v2355_v14 }
0x1734   : > { %v2921_v6 = vpop.f32.mrf.mxu1 }
0x1735   : > { %2274 = vst.msk [vmem:[%s3807_s11 + $0x28] sm:$0xff] %vm2268_vm3, %v2257_v3  ;;  %2377 = vst.msk [vmem:[%s3809_s13 + $0x38] sm:$0xff] %vm2268_vm3, %v2921_v6  ;;  %s3331_s11 = scalar_lea.vmem %s3330_s29, 2048 }
0x1736   : > { %v2358_v62 = vpop.f32.mrf.mxu1  ;;  %p3333_p11 = scmp.lt.s32.totalorder %s3331_s11, %s3325_s4 }
0x1738   : > { %p3334_p10 = por %p3333_p11, %p3332_p7 }
0x173a   : > { %p3335_p4 = pnand %p3334_p10, %p3328_p9 }
0x173c   : > { %3338 = shalt.err (!%p3335_p4)
}
0x173d   : > { %s3339_s21 = scalar_lea.hbm %s4280_s20, 1024  ;;  %s3343_s5 = scalar_lea.hbm %s4465_s14, 2048 }
0x173e   : > { %p3340_p12 = scmp.ne.s32.totalorder %s4280_s20, %s3339_s21  ;;  %p3344_p13 = scmp.lt.s32.totalorder %s4280_s20, %s4465_s14 }
0x173f   : > { %p3345_p5 = scmp.lt.s32.totalorder %s3343_s5, %s3339_s21 }
0x1740   : > { %p3341_p3 = pnand %p3340_p12, %p4468_p2 }
0x1741   : > { %p3346_p0 = por %p3345_p5, %p3344_p13 }
0x1742   : > { %p3342_p6 = pneg %p3341_p3 }
0x1744   : > { %p3347_p1 = pnand %p3346_p0, %p3342_p6 }
0x1746   : > { %3350 = shalt.err (!%p3347_p1)
}
0x1747   : > { %s3471_s4 = smov 128   ;;  %s3472_s29 = smov 8   ;;  %2375 = vst.msk [vmem:[%s3809_s13 + $0x28] sm:$0xff] %vm2268_vm3, %v2358_v62 }
0x1748   : > { %s4469_s17 = scalar_lea.sflag [#allocation10], %s3776_s26  ;;  %s2384_s11 = scalar_lea.sflag [#allocation19], %s3788_s12 }
0x1749   : > { %2938 = dma.vmem_to_hbm [thread:$0]  (%p4468_p2), %s4282_s19, 1024, %s4280_s20, %s4469_s17, %s3471_s4, %s3471_s4, %s3472_s29  }
0x174a   : > { %s3351_s21 = scalar_lea.vmem %s4298_s24, 1024  ;;  %p4470_p9 = scmp.ne.s32.totalorder %s4453_s15, 0 }
0x174b   : > { %p3352_p8 = scmp.ne.s32.totalorder %s4298_s24, %s3351_s21  ;;  %s3473_s0 = smov [#allocation18]  }
0x174c   : > { %s3355_s16 = sshll.u32 %s3473_s0, 4  ;;  %s3356_s16 = int_to_ptr.vmem [resolvable:$false] %s3355_s16 }
0x174d   : > { %p3353_p7 = pnand %p3352_p8, %p4470_p9  ;;  %s3357_s5 = scalar_lea.vmem %s3356_s16, 2048 }
0x174e   : > { %p3358_p10 = scmp.lt.s32.totalorder %s4298_s24, %s3356_s16  ;;  %p3359_p4 = scmp.lt.s32.totalorder %s3357_s5, %s3351_s21 }
0x174f   : > { %p3354_p11 = pneg %p3353_p7 }
0x1750   : > { %p3360_p12 = por %p3359_p4, %p3358_p10 }
0x1752   : > { %p3361_p3 = pnand %p3360_p12, %p3354_p11 }
0x1754   : > { %3364 = shalt.err (!%p3361_p3)
}
0x1755   : > { %s3365_s26 = scalar_lea.hbm %s4296_s30, 1024  ;;  %s3369_s19 = scalar_lea.hbm %s4467_s7, 2048 }
0x1756   : > { %p3366_p2 = scmp.ne.s32.totalorder %s4296_s30, %s3365_s26  ;;  %p3370_p5 = scmp.lt.s32.totalorder %s4296_s30, %s4467_s7 }
0x1757   : > { %p3371_p0 = scmp.lt.s32.totalorder %s3369_s19, %s3365_s26 }
0x1758   : > { %p3367_p6 = pnand %p3366_p2, %p4470_p9 }
0x1759   : > { %p3372_p1 = por %p3371_p0, %p3370_p5 }
0x175a   : > { %p3368_p13 = pneg %p3367_p6 }
0x175c   : > { %p3373_p8 = pnand %p3372_p1, %p3368_p13 }
0x175e   : > { %3376 = shalt.err (!%p3373_p8)
}
0x175f   : > { %2939 = dma.vmem_to_hbm [thread:$0]  (%p4470_p9), %s4298_s24, 1024, %s4296_s30, %s2384_s11, %s3471_s4, %s3471_s4, %s3472_s29  }
0x1760 PF: > { %s4471_s18 = sld [smem:[#allocation27_spill]]  ;;  %p4474_p11 = scmp.ge.s32.totalorder %s3455_s27, 2 }
0x1761   : > { %s4472_s17 = sld [smem:[#allocation29_spill]] }
0x1766   : > { %s2429_s21 = sand.u32 1, %s4471_s18  }
0x1767   : > { %p4473_p7 = scmp.ne.s32.totalorder %s4472_s17, 0  ;;  %s2430_s0 = scalar_lea.sflag [#allocation10], %s2429_s21 }
0x1769   : > { %p2960_p10 = pnand %p4474_p11, %p4473_p7 }
0x176b   : > { %p2961_p4 = pneg %p2960_p10 }
0x176d   : > { %3422 = dma.done.wait (%p2961_p4), %s2430_s0, 1024  }
0x176e   : > { %3424 = vsyncadd (%p2961_p4), %s2430_s0, 4294966272  ;;  %s4475_s16 = sld [smem:[#allocation26_spill]]  ;;  %p4478_p3 = pmov %p4474_p11 }
0x176f   : > { %s4476_s15 = sld [smem:[#allocation30_spill]] }
0x1774   : > { %s2438_s5 = sand.u32 1, %s4475_s16  }
0x1775   : > { %p4477_p12 = scmp.ne.s32.totalorder %s4476_s15, 0  ;;  %s2439_s24 = scalar_lea.sflag [#allocation19], %s2438_s5 }
0x1777   : > { %p2963_p2 = pnand %p4478_p3, %p4477_p12 }
0x1779   : > { %p2964_p9 = pneg %p2963_p2 }
0x177b   : > { %3426 = dma.done.wait (%p2964_p9), %s2439_s24, 1024  }
0x177c   : > { %3428 = vsyncadd (%p2964_p9), %s2439_s24, 4294966272  ;;  %s4479_s27 = sld [smem:[#allocation32_spill]]  ;;  %s4483_s21 = smov %s3435_s22 }
0x177d   : > { %s4480_s30 = sld [smem:[#allocation34_spill]]  ;;  %s4484_s22 = smov %s3439_s23 }
0x177e   : > { %s4481_s4 = sld [smem:[#allocation28_spill]]  ;;  %s4486_s24 = smov %s3447_s25 }
0x177f   : > { %s4482_s26 = sld [smem:[#allocation33_spill]] }
0x1782   : > { %p33_p6 = scmp.ge.s32.totalorder %s4479_s27, 4  }
0x1783   : > { %s4485_s23 = smov %s4480_s30 }
0x1784   : > { %s4487_s25 = smov %s4481_s4  ;;  %35 = sbr.rel (!%p33_p6) target bundleno = 19 (0x13), region = 185 }
0x1789   :  { %2444 = vsyncpa [#allocation9], 1 }
0x178a   :  { %2446 = vsyncpa [#allocation9 + $0x1], 1 }
0x178b   :  { %2447 = vsyncpa [#allocation12], 1 }
0x178c   :  { %2449 = vsyncpa [#allocation12 + $0x1], 1 }
0x178d   :  { %2450 = vsyncpa [#allocation15], 1 }
0x178e   :  { %2451 = vsyncpa [#allocation10], 1 }
0x178f   :  { %2453 = vsyncpa [#allocation10 + $0x1], 1 }
0x1790   :  { %2454 = vsyncpa [#allocation19], 1 }
0x1791   :  { %2456 = vsyncpa [#allocation19 + $0x1], 1 }

</bundles_post_ra>
